<compile_context>
chip_gen: v5e
topology: v5e:2x2
jax: 0.10.0
libtpu: 0.0.40
codegen_flags: <defaults>
</compile_context>

<pallas_src>
import jax
import jax.numpy as jnp
from jax.experimental import pallas as pl
from jax.experimental.pallas import tpu as pltpu

EPS = 1e-5  # PyTorch BatchNorm2d default eps


# ---------------------------------------------------------------------------
# In-kernel helpers
# ---------------------------------------------------------------------------
def _bn_relu(y, gb_ref, nc_ref, cn_ref):
    """Train-mode BatchNorm2d + ReLU on a rows=(h,b), lanes=(w,c) activation.

    y: (H*B, W*C) f32.  gb_ref: (2, 1, C) [gamma, beta].
    nc_ref: (W*C, C) one-hot (lane -> channel), cn_ref: (C, W*C) (channel -> lane).
    Per-channel batch statistics over the B*H*W samples of each channel
    (biased variance, one pass), matching PyTorch BatchNorm2d in training mode.
    """
    gamma = gb_ref[0]                                      # (1, C)
    beta = gb_ref[1]                                       # (1, C)
    r, n = y.shape
    c = nc_ref.shape[1]
    count = float(r * (n // c))                            # = B * H * W

    col_sum = jnp.sum(y, axis=0, keepdims=True)            # (1, N)
    col_sq = jnp.sum(y * y, axis=0, keepdims=True)         # (1, N)
    ch_sum = jnp.dot(col_sum, nc_ref[...], preferred_element_type=jnp.float32)
    ch_sq = jnp.dot(col_sq, nc_ref[...], preferred_element_type=jnp.float32)

    mean = ch_sum * (1.0 / count)                          # (1, C)
    var = jnp.maximum(ch_sq * (1.0 / count) - mean * mean, 0.0)
    scale = gamma * jax.lax.rsqrt(var + EPS)               # (1, C)
    shift = beta - mean * scale                            # (1, C)

    scale_col = jnp.dot(scale, cn_ref[...], preferred_element_type=jnp.float32)  # (1, N)
    shift_col = jnp.dot(shift, cn_ref[...], preferred_element_type=jnp.float32)
    return jnp.maximum(y * scale_col + shift_col, 0.0)


def _convt_s2(a, wcol_ref, srow_ref):
    """Stride-2 ConvTranspose2d on a rows=(h,b), lanes=(w,cin) activation.

    a:        (H_in*B, W_in*Cin) bf16
    wcol_ref: (4, W_in*Cin, W_out*Cout) bf16  per-kernel-row column scatter + channel mix
    srow_ref: (4, H_out*B, H_in*B)     f32   per-kernel-row 0/1 row scatter (overlap-add)
    returns   (H_out*B, W_out*Cout) f32
    """
    out = None
    for i in range(wcol_ref.shape[0]):
        t = jnp.dot(a, wcol_ref[i], preferred_element_type=jnp.float32)
        contrib = jnp.dot(srow_ref[i], t, preferred_element_type=jnp.float32)
        out = contrib if out is None else out + contrib
    return out


def _generator_kernel(zb_ref, g1_ref, wc2_ref, wc3_ref, wc4_ref,
                      s2_ref, s3_ref, s4_ref,
                      nc1_ref, cn1_ref, gb1_ref,
                      nc2_ref, cn2_ref, gb2_ref,
                      nc3_ref, cn3_ref, gb3_ref,
                      out_ref):
    f32 = jnp.float32
    bf16 = jnp.bfloat16

    # Layer 1: ConvT(latent -> 4*ngf, k4, s1, p0) + BN + ReLU   (1x1 -> 4x4)
    y = jnp.dot(zb_ref[...].astype(bf16), g1_ref[...], preferred_element_type=f32)
    x = _bn_relu(y, gb1_ref, nc1_ref, cn1_ref).astype(bf16)

    # Layer 2: ConvT(4*ngf -> 2*ngf, k4, s2, p1) + BN + ReLU    (4x4 -> 8x8)
    y = _convt_s2(x, wc2_ref, s2_ref)
    x = _bn_relu(y, gb2_ref, nc2_ref, cn2_ref).astype(bf16)

    # Layer 3: ConvT(2*ngf -> ngf, k4, s2, p1) + BN + ReLU      (8x8 -> 16x16)
    y = _convt_s2(x, wc3_ref, s3_ref)
    x = _bn_relu(y, gb3_ref, nc3_ref, cn3_ref).astype(bf16)

    # Layer 4: ConvT(ngf -> 1, k4, s2, p1) + Tanh               (16x16 -> 32x32)
    y = _convt_s2(x, wc4_ref, s4_ref)
    out_ref[...] = jnp.tanh(y)


# ---------------------------------------------------------------------------
# One-time parameter preprocessing (hoisted out of the forward pass)
# ---------------------------------------------------------------------------
def _wcol_matrices(w, stride, padding, w_in):
    """Per-kernel-row column-scatter GEMM matrices of a ConvTranspose2d.

    w: PyTorch ConvTranspose2d weight (Cin, Cout, K, K).
    Returns (K, W_in*Cin, W_out*Cout) with
      Wcol[i, (w*Cin+ci), (ow*Cout+co)] = w[ci, co, i, ow - (stride*w - padding)]
    (zero where the kernel-column index falls outside [0, K)).
    """
    cin, cout, kh, kw = w.shape
    w_out = (w_in - 1) * stride - 2 * padding + kw
    ow = jnp.arange(w_out)[None, :]
    wi = jnp.arange(w_in)[:, None]
    j = ow - (stride * wi - padding)                       # (W_in, W_out)
    valid = ((j >= 0) & (j < kw)).astype(w.dtype)
    jc = jnp.clip(j, 0, kw - 1)
    wt = jnp.transpose(w, (2, 3, 0, 1))                    # (K_i, K_j, Cin, Cout)
    g = wt[:, jc, :, :]                                    # (K_i, W_in, W_out, Cin, Cout)
    g = g * valid[None, :, :, None, None]
    g = jnp.transpose(g, (0, 1, 3, 2, 4))                  # (K_i, W_in, Cin, W_out, Cout)
    return g.reshape(kh, w_in * cin, w_out * cout)


def _row_scatter_matrices(h_in, stride, padding, k, batch):
    """0/1 overlap-add matrices (one per kernel row), block-diagonal over batch.

    Returns (K, H_out*B, H_in*B) f32 with
      S[i, (oh*B + b'), (h*B + b)] = [b'==b] * [oh == stride*h - padding + i].
    Out-of-range rows (padding clipping) simply have no 1s -> dropped.
    """
    h_out = (h_in - 1) * stride - 2 * padding + k
    oh = jnp.arange(h_out)[:, None]
    h = jnp.arange(h_in)[None, :]
    base = jnp.stack([(oh == stride * h - padding + i) for i in range(k)])
    base = base.astype(jnp.float32)                        # (K, H_out, H_in)
    eye = jnp.eye(batch, dtype=jnp.float32)
    s = jnp.einsum('koi,pq->kopiq', base, eye)             # (K, H_out, B, H_in, B)
    return s.reshape(k, h_out * batch, h_in * batch)


def _bn_onehots(w_sp, c):
    """Lane->channel (N,C) and channel->lane (C,N) one-hot matrices (lanes = (w, c))."""
    nc = jnp.tile(jnp.eye(c, dtype=jnp.float32), (w_sp, 1))
    return nc, nc.T


def init_generator_params(key, latent_dim=16, ngf=8):
    """DCGAN init: conv weights N(0, 0.02), BN gamma N(1, 0.02), BN beta = 0."""
    ks = jax.random.split(key, 7)
    std = 0.02
    return {
        "w1": std * jax.random.normal(ks[0], (latent_dim, ngf * 4, 4, 4), jnp.float32),
        "w2": std * jax.random.normal(ks[1], (ngf * 4, ngf * 2, 4, 4), jnp.float32),
        "w3": std * jax.random.normal(ks[2], (ngf * 2, ngf, 4, 4), jnp.float32),
        "w4": std * jax.random.normal(ks[3], (ngf, 1, 4, 4), jnp.float32),
        "g1": 1.0 + std * jax.random.normal(ks[4], (ngf * 4,), jnp.float32),
        "g2": 1.0 + std * jax.random.normal(ks[5], (ngf * 2,), jnp.float32),
        "g3": 1.0 + std * jax.random.normal(ks[6], (ngf,), jnp.float32),
        "b1": jnp.zeros((ngf * 4,), jnp.float32),
        "b2": jnp.zeros((ngf * 2,), jnp.float32),
        "b3": jnp.zeros((ngf,), jnp.float32),
    }


def prepare_kernel_params(raw, batch):
    """Lower raw weights to kernel-ready factored form once (not per forward call)."""
    bf16 = jnp.bfloat16
    latent = raw["w1"].shape[0]
    c1 = raw["w1"].shape[1]
    # Layer 1 (1x1 -> 4x4, s1, p0): G1blk[(h*latent+ci), (w*C1+co)] = w1[ci, co, h, w];
    # consumed by the block-diagonal z built in the wrapper.
    g1blk = jnp.transpose(raw["w1"], (2, 0, 3, 1)).reshape(4 * latent, 4 * c1)

    kp = {
        "g1blk": g1blk.astype(bf16),
        "wc2": _wcol_matrices(raw["w2"], 2, 1, 4).astype(bf16),
        "wc3": _wcol_matrices(raw["w3"], 2, 1, 8).astype(bf16),
        "wc4": _wcol_matrices(raw["w4"], 2, 1, 16).astype(bf16),
        "s2": _row_scatter_matrices(4, 2, 1, 4, batch),
        "s3": _row_scatter_matrices(8, 2, 1, 4, batch),
        "s4": _row_scatter_matrices(16, 2, 1, 4, batch),
    }
    bn_cfg = [(4, raw["g1"], raw["b1"]), (8, raw["g2"], raw["b2"]), (16, raw["g3"], raw["b3"])]
    for idx, (w_sp, gam, bet) in enumerate(bn_cfg, start=1):
        c = gam.shape[0]
        nc, cn = _bn_onehots(w_sp, c)
        kp[f"nc{idx}"] = nc
        kp[f"cn{idx}"] = cn
        kp[f"gb{idx}"] = jnp.stack([gam.reshape(1, c), bet.reshape(1, c)])
    return kp


# ---------------------------------------------------------------------------
# Forward pass
# ---------------------------------------------------------------------------
def _full_block(shape):
    nd = len(shape)
    return pl.BlockSpec(shape, lambda i, _n=nd: (0,) * _n)


@jax.jit
def generator_forward(z, kp):
    """z: (B, latent_dim) -> image (B, 1, 28, 28), matching the PyTorch module."""
    b, latent = z.shape
    # Input-side layout plumbing (tiny): place z on the block diagonal so a single
    # GEMM emits layer-1's output directly in the rows=(h,b), lanes=(w,c) layout.
    zb = jnp.einsum('hk,bl->hbkl', jnp.eye(4, dtype=z.dtype), z).reshape(4 * b, 4 * latent)

    args = (zb, kp["g1blk"], kp["wc2"], kp["wc3"], kp["wc4"],
            kp["s2"], kp["s3"], kp["s4"],
            kp["nc1"], kp["cn1"], kp["gb1"],
            kp["nc2"], kp["cn2"], kp["gb2"],
            kp["nc3"], kp["cn3"], kp["gb3"])

    out = pl.pallas_call(
        _generator_kernel,
        out_shape=jax.ShapeDtypeStruct((32 * b, 32), jnp.float32),
        grid=(1,),
        in_specs=[_full_block(a.shape) for a in args],
        out_specs=_full_block((32 * b, 32)),
        compiler_params=pltpu.CompilerParams(
            dimension_semantics=("arbitrary",),
            vmem_limit_bytes=16 * 1024 * 1024,
        ),
    )(*args)

    # Output-side layout plumbing: rows are (oh, b) -> NCHW + the module's 2:30 crop.
    img = out.reshape(32, b, 32).transpose(1, 0, 2)[:, None, :, :]
    return img[:, :, 2:30, 2:30]


# ---------------------------------------------------------------------------
# Plain-JAX reference (mirrors the PyTorch module; bf16 weights/activations)
# ---------------------------------------------------------------------------
def _convt_dense_matrix(w, stride, padding, hin, win):
    cin, cout, kh, kw = w.shape
    hout = (hin - 1) * stride - 2 * padding + kh
    wout = (win - 1) * stride - 2 * padding + kw
    r = jnp.arange(hout)[None, :] - stride * jnp.arange(hin)[:, None] + padding
    c = jnp.arange(wout)[None, :] - stride * jnp.arange(win)[:, None] + padding
    rv = ((r >= 0) & (r < kh)).astype(w.dtype)
    cv = ((c >= 0) & (c < kw)).astype(w.dtype)
    g = jnp.take(w, jnp.clip(r, 0, kh - 1), axis=2)
    g = jnp.take(g, jnp.clip(c, 0, kw - 1), axis=4)
    g = g * rv[None, None, :, :, None, None] * cv[None, None, None, None, :, :]
    g = jnp.transpose(g, (0, 2, 4, 1, 3, 5))
    return g.reshape(cin * hin * win, cout * hout * wout)


def _reference_forward(z, raw):
    f32, bf16 = jnp.float32, jnp.bfloat16

    def convt(x, w, stride, padding):
        bsz, cin, h, wd = x.shape
        cout, k = w.shape[1], w.shape[2]
        ho = (h - 1) * stride - 2 * padding + k
        wo = (wd - 1) * stride - 2 * padding + k
        g = _convt_dense_matrix(w.astype(bf16).astype(f32), stride, padding, h, wd)
        y = jnp.dot(x.reshape(bsz, -1).astype(bf16).astype(f32), g,
                    preferred_element_type=f32)
        return y.reshape(bsz, cout, ho, wo)

    def bn_relu(x, gamma, beta):
        mean = jnp.mean(x, axis=(0, 2, 3), keepdims=True)
        var = jnp.var(x, axis=(0, 2, 3), keepdims=True)
        xn = (x - mean) * jax.lax.rsqrt(var + EPS)
        return jnp.maximum(gamma[None, :, None, None] * xn + beta[None, :, None, None], 0.0)

    x = z[:, :, None, None]
    x = bn_relu(convt(x, raw["w1"], 1, 0), raw["g1"], raw["b1"])
    x = bn_relu(convt(x, raw["w2"], 2, 1), raw["g2"], raw["b2"])
    x = bn_relu(convt(x, raw["w3"], 2, 1), raw["g3"], raw["b3"])
    img = jnp.tanh(convt(x, raw["w4"], 2, 1))
    return img[:, :, 2:30, 2:30]


if __name__ == "__main__":
    key = jax.random.PRNGKey(0)
    pkey, zkey = jax.random.split(key)

    latent_dim, ngf, batch = 16, 8, 2
    raw_params = init_generator_params(pkey, latent_dim=latent_dim, ngf=ngf)
    kernel_params = prepare_kernel_params(raw_params, batch=batch)  # one-time prep
    z = jax.random.normal(zkey, (batch, latent_dim), jnp.float32)

    img = jax.block_until_ready(generator_forward(z, kernel_params))
    ref = jax.block_until_ready(_reference_forward(z, raw_params))

    assert img.shape == (batch, 1, 28, 28), img.shape
    assert bool(jnp.all(jnp.isfinite(img)))
    assert bool(jnp.all(jnp.abs(img) <= 1.0))  # tanh range
    assert bool(jnp.max(jnp.abs(img - ref)) < 2e-2), float(jnp.max(jnp.abs(img - ref)))
    print("KERNEL_OK")
</pallas_src>

<mosaic_0001>
module attributes {stable_mosaic.version = 11 : i64} {
  func.func @_generator_kernel(%arg0: i32, %arg1: memref<8x64xf32, #tpu.memory_space<vmem>>, %arg2: memref<64x128xbf16, #tpu.memory_space<vmem>>, %arg3: memref<4x128x128xbf16, #tpu.memory_space<vmem>>, %arg4: memref<4x128x128xbf16, #tpu.memory_space<vmem>>, %arg5: memref<4x128x32xbf16, #tpu.memory_space<vmem>>, %arg6: memref<4x16x8xf32, #tpu.memory_space<vmem>>, %arg7: memref<4x32x16xf32, #tpu.memory_space<vmem>>, %arg8: memref<4x64x32xf32, #tpu.memory_space<vmem>>, %arg9: memref<128x32xf32, #tpu.memory_space<vmem>>, %arg10: memref<32x128xf32, #tpu.memory_space<vmem>>, %arg11: memref<2x1x32xf32, #tpu.memory_space<vmem>>, %arg12: memref<128x16xf32, #tpu.memory_space<vmem>>, %arg13: memref<16x128xf32, #tpu.memory_space<vmem>>, %arg14: memref<2x1x16xf32, #tpu.memory_space<vmem>>, %arg15: memref<128x8xf32, #tpu.memory_space<vmem>>, %arg16: memref<8x128xf32, #tpu.memory_space<vmem>>, %arg17: memref<2x1x8xf32, #tpu.memory_space<vmem>>, %arg18: memref<64x32xf32, #tpu.memory_space<vmem>>) attributes {dimension_semantics = [#tpu.dimension_semantics<arbitrary>], iteration_bounds = array<i64: 1>, scalar_prefetch = 0 : i64, scratch_operands = 0 : i64, tpu.core_type = #tpu.core_type<tc>, window_params = [{pipeline_mode = #tpu.pipeline_mode<synchronous>, transform_indices = @transform_0, window_bounds = array<i64: 8, 64>}, {pipeline_mode = #tpu.pipeline_mode<synchronous>, transform_indices = @transform_1, window_bounds = array<i64: 64, 128>}, {pipeline_mode = #tpu.pipeline_mode<synchronous>, transform_indices = @transform_2, window_bounds = array<i64: 4, 128, 128>}, {pipeline_mode = #tpu.pipeline_mode<synchronous>, transform_indices = @transform_3, window_bounds = array<i64: 4, 128, 128>}, {pipeline_mode = #tpu.pipeline_mode<synchronous>, transform_indices = @transform_4, window_bounds = array<i64: 4, 128, 32>}, {pipeline_mode = #tpu.pipeline_mode<synchronous>, transform_indices = @transform_5, window_bounds = array<i64: 4, 16, 8>}, {pipeline_mode = #tpu.pipeline_mode<synchronous>, transform_indices = @transform_6, window_bounds = array<i64: 4, 32, 16>}, {pipeline_mode = #tpu.pipeline_mode<synchronous>, transform_indices = @transform_7, window_bounds = array<i64: 4, 64, 32>}, {pipeline_mode = #tpu.pipeline_mode<synchronous>, transform_indices = @transform_8, window_bounds = array<i64: 128, 32>}, {pipeline_mode = #tpu.pipeline_mode<synchronous>, transform_indices = @transform_9, window_bounds = array<i64: 32, 128>}, {pipeline_mode = #tpu.pipeline_mode<synchronous>, transform_indices = @transform_10, window_bounds = array<i64: 2, 1, 32>}, {pipeline_mode = #tpu.pipeline_mode<synchronous>, transform_indices = @transform_11, window_bounds = array<i64: 128, 16>}, {pipeline_mode = #tpu.pipeline_mode<synchronous>, transform_indices = @transform_12, window_bounds = array<i64: 16, 128>}, {pipeline_mode = #tpu.pipeline_mode<synchronous>, transform_indices = @transform_13, window_bounds = array<i64: 2, 1, 16>}, {pipeline_mode = #tpu.pipeline_mode<synchronous>, transform_indices = @transform_14, window_bounds = array<i64: 128, 8>}, {pipeline_mode = #tpu.pipeline_mode<synchronous>, transform_indices = @transform_15, window_bounds = array<i64: 8, 128>}, {pipeline_mode = #tpu.pipeline_mode<synchronous>, transform_indices = @transform_16, window_bounds = array<i64: 2, 1, 8>}, {pipeline_mode = #tpu.pipeline_mode<synchronous>, transform_indices = @transform_17, window_bounds = array<i64: 64, 32>}]} {
    %c0 = arith.constant 0 : index
    %c0_0 = arith.constant 0 : index
    %0 = vector.load %arg1[%c0, %c0_0] : memref<8x64xf32, #tpu.memory_space<vmem>>, vector<8x64xf32>
    %1 = arith.truncf %0 : vector<8x64xf32> to vector<8x64xbf16>
    %c0_1 = arith.constant 0 : index
    %c0_2 = arith.constant 0 : index
    %2 = vector.load %arg2[%c0_1, %c0_2] : memref<64x128xbf16, #tpu.memory_space<vmem>>, vector<64x128xbf16>
    %cst = arith.constant dense<0.000000e+00> : vector<8x128xf32>
    %3 = tpu.matmul %1, %2, %cst {dimension_numbers = #tpu.dot_dimension_numbers<[1], [0], [0], [1], [0, 0, 1, 1], [], []>} : vector<8x64xbf16>, vector<64x128xbf16>, vector<8x128xf32> -> vector<8x128xf32>
    %c0_3 = arith.constant 0 : index
    %c0_4 = arith.constant 0 : index
    %c0_5 = arith.constant 0 : index
    %4 = vector.load %arg11[%c0_3, %c0_4, %c0_5] : memref<2x1x32xf32, #tpu.memory_space<vmem>>, vector<1x1x32xf32>
    %5 = vector.shape_cast %4 : vector<1x1x32xf32> to vector<1x32xf32>
    %c1 = arith.constant 1 : index
    %c0_6 = arith.constant 0 : index
    %c0_7 = arith.constant 0 : index
    %6 = vector.load %arg11[%c1, %c0_6, %c0_7] : memref<2x1x32xf32, #tpu.memory_space<vmem>>, vector<1x1x32xf32>
    %7 = vector.shape_cast %6 : vector<1x1x32xf32> to vector<1x32xf32>
    %cst_8 = arith.constant dense<0.000000e+00> : vector<128xf32>
    %8 = vector.multi_reduction <add>, %3, %cst_8 [0] : vector<8x128xf32> to vector<128xf32>
    %9 = vector.shape_cast %8 : vector<128xf32> to vector<1x128xf32>
    %10 = arith.mulf %3, %3 : vector<8x128xf32>
    %cst_9 = arith.constant dense<0.000000e+00> : vector<128xf32>
    %11 = vector.multi_reduction <add>, %10, %cst_9 [0] : vector<8x128xf32> to vector<128xf32>
    %12 = vector.shape_cast %11 : vector<128xf32> to vector<1x128xf32>
    %c0_10 = arith.constant 0 : index
    %c0_11 = arith.constant 0 : index
    %13 = vector.load %arg9[%c0_10, %c0_11] : memref<128x32xf32, #tpu.memory_space<vmem>>, vector<128x32xf32>
    %cst_12 = arith.constant dense<0.000000e+00> : vector<1x32xf32>
    %14 = tpu.matmul %9, %13, %cst_12 {dimension_numbers = #tpu.dot_dimension_numbers<[1], [0], [0], [1], [0, 0, 1, 1], [], []>} : vector<1x128xf32>, vector<128x32xf32>, vector<1x32xf32> -> vector<1x32xf32>
    %c0_13 = arith.constant 0 : index
    %c0_14 = arith.constant 0 : index
    %15 = vector.load %arg9[%c0_13, %c0_14] : memref<128x32xf32, #tpu.memory_space<vmem>>, vector<128x32xf32>
    %cst_15 = arith.constant dense<0.000000e+00> : vector<1x32xf32>
    %16 = tpu.matmul %12, %15, %cst_15 {dimension_numbers = #tpu.dot_dimension_numbers<[1], [0], [0], [1], [0, 0, 1, 1], [], []>} : vector<1x128xf32>, vector<128x32xf32>, vector<1x32xf32> -> vector<1x32xf32>
    %cst_16 = arith.constant 3.125000e-02 : f32
    %17 = vector.broadcast %cst_16 : f32 to vector<1x32xf32>
    %18 = arith.mulf %14, %17 : vector<1x32xf32>
    %cst_17 = arith.constant 3.125000e-02 : f32
    %19 = vector.broadcast %cst_17 : f32 to vector<1x32xf32>
    %20 = arith.mulf %16, %19 : vector<1x32xf32>
    %21 = arith.mulf %18, %18 : vector<1x32xf32>
    %22 = arith.subf %20, %21 : vector<1x32xf32>
    %cst_18 = arith.constant 0.000000e+00 : f32
    %23 = vector.broadcast %cst_18 : f32 to vector<1x32xf32>
    %24 = arith.maximumf %22, %23 : vector<1x32xf32>
    %cst_19 = arith.constant 9.99999974E-6 : f32
    %25 = vector.broadcast %cst_19 : f32 to vector<1x32xf32>
    %26 = arith.addf %24, %25 : vector<1x32xf32>
    %27 = math.rsqrt %26 : vector<1x32xf32>
    %28 = arith.mulf %5, %27 : vector<1x32xf32>
    %29 = arith.mulf %18, %28 : vector<1x32xf32>
    %30 = arith.subf %7, %29 : vector<1x32xf32>
    %c0_20 = arith.constant 0 : index
    %c0_21 = arith.constant 0 : index
    %31 = vector.load %arg10[%c0_20, %c0_21] : memref<32x128xf32, #tpu.memory_space<vmem>>, vector<32x128xf32>
    %cst_22 = arith.constant dense<0.000000e+00> : vector<1x128xf32>
    %32 = tpu.matmul %28, %31, %cst_22 {dimension_numbers = #tpu.dot_dimension_numbers<[1], [0], [0], [1], [0, 0, 1, 1], [], []>} : vector<1x32xf32>, vector<32x128xf32>, vector<1x128xf32> -> vector<1x128xf32>
    %c0_23 = arith.constant 0 : index
    %c0_24 = arith.constant 0 : index
    %33 = vector.load %arg10[%c0_23, %c0_24] : memref<32x128xf32, #tpu.memory_space<vmem>>, vector<32x128xf32>
    %cst_25 = arith.constant dense<0.000000e+00> : vector<1x128xf32>
    %34 = tpu.matmul %30, %33, %cst_25 {dimension_numbers = #tpu.dot_dimension_numbers<[1], [0], [0], [1], [0, 0, 1, 1], [], []>} : vector<1x32xf32>, vector<32x128xf32>, vector<1x128xf32> -> vector<1x128xf32>
    %35 = vector.broadcast %32 : vector<1x128xf32> to vector<8x128xf32>
    %36 = arith.mulf %3, %35 : vector<8x128xf32>
    %37 = vector.broadcast %34 : vector<1x128xf32> to vector<8x128xf32>
    %38 = arith.addf %36, %37 : vector<8x128xf32>
    %cst_26 = arith.constant 0.000000e+00 : f32
    %39 = vector.broadcast %cst_26 : f32 to vector<8x128xf32>
    %40 = arith.maximumf %38, %39 : vector<8x128xf32>
    %41 = arith.truncf %40 : vector<8x128xf32> to vector<8x128xbf16>
    %c0_27 = arith.constant 0 : index
    %c0_28 = arith.constant 0 : index
    %c0_29 = arith.constant 0 : index
    %42 = vector.load %arg3[%c0_27, %c0_28, %c0_29] : memref<4x128x128xbf16, #tpu.memory_space<vmem>>, vector<1x128x128xbf16>
    %43 = vector.shape_cast %42 : vector<1x128x128xbf16> to vector<128x128xbf16>
    %cst_30 = arith.constant dense<0.000000e+00> : vector<8x128xf32>
    %44 = tpu.matmul %41, %43, %cst_30 {dimension_numbers = #tpu.dot_dimension_numbers<[1], [0], [0], [1], [0, 0, 1, 1], [], []>} : vector<8x128xbf16>, vector<128x128xbf16>, vector<8x128xf32> -> vector<8x128xf32>
    %c0_31 = arith.constant 0 : index
    %c0_32 = arith.constant 0 : index
    %c0_33 = arith.constant 0 : index
    %45 = vector.load %arg6[%c0_31, %c0_32, %c0_33] : memref<4x16x8xf32, #tpu.memory_space<vmem>>, vector<1x16x8xf32>
    %46 = vector.shape_cast %45 : vector<1x16x8xf32> to vector<16x8xf32>
    %cst_34 = arith.constant dense<0.000000e+00> : vector<16x128xf32>
    %47 = tpu.matmul %46, %44, %cst_34 {dimension_numbers = #tpu.dot_dimension_numbers<[1], [0], [0], [1], [0, 0, 1, 1], [], []>} : vector<16x8xf32>, vector<8x128xf32>, vector<16x128xf32> -> vector<16x128xf32>
    %c1_35 = arith.constant 1 : index
    %c0_36 = arith.constant 0 : index
    %c0_37 = arith.constant 0 : index
    %48 = vector.load %arg3[%c1_35, %c0_36, %c0_37] : memref<4x128x128xbf16, #tpu.memory_space<vmem>>, vector<1x128x128xbf16>
    %49 = vector.shape_cast %48 : vector<1x128x128xbf16> to vector<128x128xbf16>
    %cst_38 = arith.constant dense<0.000000e+00> : vector<8x128xf32>
    %50 = tpu.matmul %41, %49, %cst_38 {dimension_numbers = #tpu.dot_dimension_numbers<[1], [0], [0], [1], [0, 0, 1, 1], [], []>} : vector<8x128xbf16>, vector<128x128xbf16>, vector<8x128xf32> -> vector<8x128xf32>
    %c1_39 = arith.constant 1 : index
    %c0_40 = arith.constant 0 : index
    %c0_41 = arith.constant 0 : index
    %51 = vector.load %arg6[%c1_39, %c0_40, %c0_41] : memref<4x16x8xf32, #tpu.memory_space<vmem>>, vector<1x16x8xf32>
    %52 = vector.shape_cast %51 : vector<1x16x8xf32> to vector<16x8xf32>
    %cst_42 = arith.constant dense<0.000000e+00> : vector<16x128xf32>
    %53 = tpu.matmul %52, %50, %cst_42 {dimension_numbers = #tpu.dot_dimension_numbers<[1], [0], [0], [1], [0, 0, 1, 1], [], []>} : vector<16x8xf32>, vector<8x128xf32>, vector<16x128xf32> -> vector<16x128xf32>
    %54 = arith.addf %47, %53 : vector<16x128xf32>
    %c2 = arith.constant 2 : index
    %c0_43 = arith.constant 0 : index
    %c0_44 = arith.constant 0 : index
    %55 = vector.load %arg3[%c2, %c0_43, %c0_44] : memref<4x128x128xbf16, #tpu.memory_space<vmem>>, vector<1x128x128xbf16>
    %56 = vector.shape_cast %55 : vector<1x128x128xbf16> to vector<128x128xbf16>
    %cst_45 = arith.constant dense<0.000000e+00> : vector<8x128xf32>
    %57 = tpu.matmul %41, %56, %cst_45 {dimension_numbers = #tpu.dot_dimension_numbers<[1], [0], [0], [1], [0, 0, 1, 1], [], []>} : vector<8x128xbf16>, vector<128x128xbf16>, vector<8x128xf32> -> vector<8x128xf32>
    %c2_46 = arith.constant 2 : index
    %c0_47 = arith.constant 0 : index
    %c0_48 = arith.constant 0 : index
    %58 = vector.load %arg6[%c2_46, %c0_47, %c0_48] : memref<4x16x8xf32, #tpu.memory_space<vmem>>, vector<1x16x8xf32>
    %59 = vector.shape_cast %58 : vector<1x16x8xf32> to vector<16x8xf32>
    %cst_49 = arith.constant dense<0.000000e+00> : vector<16x128xf32>
    %60 = tpu.matmul %59, %57, %cst_49 {dimension_numbers = #tpu.dot_dimension_numbers<[1], [0], [0], [1], [0, 0, 1, 1], [], []>} : vector<16x8xf32>, vector<8x128xf32>, vector<16x128xf32> -> vector<16x128xf32>
    %61 = arith.addf %54, %60 : vector<16x128xf32>
    %c3 = arith.constant 3 : index
    %c0_50 = arith.constant 0 : index
    %c0_51 = arith.constant 0 : index
    %62 = vector.load %arg3[%c3, %c0_50, %c0_51] : memref<4x128x128xbf16, #tpu.memory_space<vmem>>, vector<1x128x128xbf16>
    %63 = vector.shape_cast %62 : vector<1x128x128xbf16> to vector<128x128xbf16>
    %cst_52 = arith.constant dense<0.000000e+00> : vector<8x128xf32>
    %64 = tpu.matmul %41, %63, %cst_52 {dimension_numbers = #tpu.dot_dimension_numbers<[1], [0], [0], [1], [0, 0, 1, 1], [], []>} : vector<8x128xbf16>, vector<128x128xbf16>, vector<8x128xf32> -> vector<8x128xf32>
    %c3_53 = arith.constant 3 : index
    %c0_54 = arith.constant 0 : index
    %c0_55 = arith.constant 0 : index
    %65 = vector.load %arg6[%c3_53, %c0_54, %c0_55] : memref<4x16x8xf32, #tpu.memory_space<vmem>>, vector<1x16x8xf32>
    %66 = vector.shape_cast %65 : vector<1x16x8xf32> to vector<16x8xf32>
    %cst_56 = arith.constant dense<0.000000e+00> : vector<16x128xf32>
    %67 = tpu.matmul %66, %64, %cst_56 {dimension_numbers = #tpu.dot_dimension_numbers<[1], [0], [0], [1], [0, 0, 1, 1], [], []>} : vector<16x8xf32>, vector<8x128xf32>, vector<16x128xf32> -> vector<16x128xf32>
    %68 = arith.addf %61, %67 : vector<16x128xf32>
    %c0_57 = arith.constant 0 : index
    %c0_58 = arith.constant 0 : index
    %c0_59 = arith.constant 0 : index
    %69 = vector.load %arg14[%c0_57, %c0_58, %c0_59] : memref<2x1x16xf32, #tpu.memory_space<vmem>>, vector<1x1x16xf32>
    %70 = vector.shape_cast %69 : vector<1x1x16xf32> to vector<1x16xf32>
    %c1_60 = arith.constant 1 : index
    %c0_61 = arith.constant 0 : index
    %c0_62 = arith.constant 0 : index
    %71 = vector.load %arg14[%c1_60, %c0_61, %c0_62] : memref<2x1x16xf32, #tpu.memory_space<vmem>>, vector<1x1x16xf32>
    %72 = vector.shape_cast %71 : vector<1x1x16xf32> to vector<1x16xf32>
    %cst_63 = arith.constant dense<0.000000e+00> : vector<128xf32>
    %73 = vector.multi_reduction <add>, %68, %cst_63 [0] : vector<16x128xf32> to vector<128xf32>
    %74 = vector.shape_cast %73 : vector<128xf32> to vector<1x128xf32>
    %75 = arith.mulf %68, %68 : vector<16x128xf32>
    %cst_64 = arith.constant dense<0.000000e+00> : vector<128xf32>
    %76 = vector.multi_reduction <add>, %75, %cst_64 [0] : vector<16x128xf32> to vector<128xf32>
    %77 = vector.shape_cast %76 : vector<128xf32> to vector<1x128xf32>
    %c0_65 = arith.constant 0 : index
    %c0_66 = arith.constant 0 : index
    %78 = vector.load %arg12[%c0_65, %c0_66] : memref<128x16xf32, #tpu.memory_space<vmem>>, vector<128x16xf32>
    %cst_67 = arith.constant dense<0.000000e+00> : vector<1x16xf32>
    %79 = tpu.matmul %74, %78, %cst_67 {dimension_numbers = #tpu.dot_dimension_numbers<[1], [0], [0], [1], [0, 0, 1, 1], [], []>} : vector<1x128xf32>, vector<128x16xf32>, vector<1x16xf32> -> vector<1x16xf32>
    %c0_68 = arith.constant 0 : index
    %c0_69 = arith.constant 0 : index
    %80 = vector.load %arg12[%c0_68, %c0_69] : memref<128x16xf32, #tpu.memory_space<vmem>>, vector<128x16xf32>
    %cst_70 = arith.constant dense<0.000000e+00> : vector<1x16xf32>
    %81 = tpu.matmul %77, %80, %cst_70 {dimension_numbers = #tpu.dot_dimension_numbers<[1], [0], [0], [1], [0, 0, 1, 1], [], []>} : vector<1x128xf32>, vector<128x16xf32>, vector<1x16xf32> -> vector<1x16xf32>
    %cst_71 = arith.constant 7.812500e-03 : f32
    %82 = vector.broadcast %cst_71 : f32 to vector<1x16xf32>
    %83 = arith.mulf %79, %82 : vector<1x16xf32>
    %cst_72 = arith.constant 7.812500e-03 : f32
    %84 = vector.broadcast %cst_72 : f32 to vector<1x16xf32>
    %85 = arith.mulf %81, %84 : vector<1x16xf32>
    %86 = arith.mulf %83, %83 : vector<1x16xf32>
    %87 = arith.subf %85, %86 : vector<1x16xf32>
    %cst_73 = arith.constant 0.000000e+00 : f32
    %88 = vector.broadcast %cst_73 : f32 to vector<1x16xf32>
    %89 = arith.maximumf %87, %88 : vector<1x16xf32>
    %cst_74 = arith.constant 9.99999974E-6 : f32
    %90 = vector.broadcast %cst_74 : f32 to vector<1x16xf32>
    %91 = arith.addf %89, %90 : vector<1x16xf32>
    %92 = math.rsqrt %91 : vector<1x16xf32>
    %93 = arith.mulf %70, %92 : vector<1x16xf32>
    %94 = arith.mulf %83, %93 : vector<1x16xf32>
    %95 = arith.subf %72, %94 : vector<1x16xf32>
    %c0_75 = arith.constant 0 : index
    %c0_76 = arith.constant 0 : index
    %96 = vector.load %arg13[%c0_75, %c0_76] : memref<16x128xf32, #tpu.memory_space<vmem>>, vector<16x128xf32>
    %cst_77 = arith.constant dense<0.000000e+00> : vector<1x128xf32>
    %97 = tpu.matmul %93, %96, %cst_77 {dimension_numbers = #tpu.dot_dimension_numbers<[1], [0], [0], [1], [0, 0, 1, 1], [], []>} : vector<1x16xf32>, vector<16x128xf32>, vector<1x128xf32> -> vector<1x128xf32>
    %c0_78 = arith.constant 0 : index
    %c0_79 = arith.constant 0 : index
    %98 = vector.load %arg13[%c0_78, %c0_79] : memref<16x128xf32, #tpu.memory_space<vmem>>, vector<16x128xf32>
    %cst_80 = arith.constant dense<0.000000e+00> : vector<1x128xf32>
    %99 = tpu.matmul %95, %98, %cst_80 {dimension_numbers = #tpu.dot_dimension_numbers<[1], [0], [0], [1], [0, 0, 1, 1], [], []>} : vector<1x16xf32>, vector<16x128xf32>, vector<1x128xf32> -> vector<1x128xf32>
    %100 = vector.broadcast %97 : vector<1x128xf32> to vector<16x128xf32>
    %101 = arith.mulf %68, %100 : vector<16x128xf32>
    %102 = vector.broadcast %99 : vector<1x128xf32> to vector<16x128xf32>
    %103 = arith.addf %101, %102 : vector<16x128xf32>
    %cst_81 = arith.constant 0.000000e+00 : f32
    %104 = vector.broadcast %cst_81 : f32 to vector<16x128xf32>
    %105 = arith.maximumf %103, %104 : vector<16x128xf32>
    %106 = arith.truncf %105 : vector<16x128xf32> to vector<16x128xbf16>
    %c0_82 = arith.constant 0 : index
    %c0_83 = arith.constant 0 : index
    %c0_84 = arith.constant 0 : index
    %107 = vector.load %arg4[%c0_82, %c0_83, %c0_84] : memref<4x128x128xbf16, #tpu.memory_space<vmem>>, vector<1x128x128xbf16>
    %108 = vector.shape_cast %107 : vector<1x128x128xbf16> to vector<128x128xbf16>
    %cst_85 = arith.constant dense<0.000000e+00> : vector<16x128xf32>
    %109 = tpu.matmul %106, %108, %cst_85 {dimension_numbers = #tpu.dot_dimension_numbers<[1], [0], [0], [1], [0, 0, 1, 1], [], []>} : vector<16x128xbf16>, vector<128x128xbf16>, vector<16x128xf32> -> vector<16x128xf32>
    %c0_86 = arith.constant 0 : index
    %c0_87 = arith.constant 0 : index
    %c0_88 = arith.constant 0 : index
    %110 = vector.load %arg7[%c0_86, %c0_87, %c0_88] : memref<4x32x16xf32, #tpu.memory_space<vmem>>, vector<1x32x16xf32>
    %111 = vector.shape_cast %110 : vector<1x32x16xf32> to vector<32x16xf32>
    %cst_89 = arith.constant dense<0.000000e+00> : vector<32x128xf32>
    %112 = tpu.matmul %111, %109, %cst_89 {dimension_numbers = #tpu.dot_dimension_numbers<[1], [0], [0], [1], [0, 0, 1, 1], [], []>} : vector<32x16xf32>, vector<16x128xf32>, vector<32x128xf32> -> vector<32x128xf32>
    %c1_90 = arith.constant 1 : index
    %c0_91 = arith.constant 0 : index
    %c0_92 = arith.constant 0 : index
    %113 = vector.load %arg4[%c1_90, %c0_91, %c0_92] : memref<4x128x128xbf16, #tpu.memory_space<vmem>>, vector<1x128x128xbf16>
    %114 = vector.shape_cast %113 : vector<1x128x128xbf16> to vector<128x128xbf16>
    %cst_93 = arith.constant dense<0.000000e+00> : vector<16x128xf32>
    %115 = tpu.matmul %106, %114, %cst_93 {dimension_numbers = #tpu.dot_dimension_numbers<[1], [0], [0], [1], [0, 0, 1, 1], [], []>} : vector<16x128xbf16>, vector<128x128xbf16>, vector<16x128xf32> -> vector<16x128xf32>
    %c1_94 = arith.constant 1 : index
    %c0_95 = arith.constant 0 : index
    %c0_96 = arith.constant 0 : index
    %116 = vector.load %arg7[%c1_94, %c0_95, %c0_96] : memref<4x32x16xf32, #tpu.memory_space<vmem>>, vector<1x32x16xf32>
    %117 = vector.shape_cast %116 : vector<1x32x16xf32> to vector<32x16xf32>
    %cst_97 = arith.constant dense<0.000000e+00> : vector<32x128xf32>
    %118 = tpu.matmul %117, %115, %cst_97 {dimension_numbers = #tpu.dot_dimension_numbers<[1], [0], [0], [1], [0, 0, 1, 1], [], []>} : vector<32x16xf32>, vector<16x128xf32>, vector<32x128xf32> -> vector<32x128xf32>
    %119 = arith.addf %112, %118 : vector<32x128xf32>
    %c2_98 = arith.constant 2 : index
    %c0_99 = arith.constant 0 : index
    %c0_100 = arith.constant 0 : index
    %120 = vector.load %arg4[%c2_98, %c0_99, %c0_100] : memref<4x128x128xbf16, #tpu.memory_space<vmem>>, vector<1x128x128xbf16>
    %121 = vector.shape_cast %120 : vector<1x128x128xbf16> to vector<128x128xbf16>
    %cst_101 = arith.constant dense<0.000000e+00> : vector<16x128xf32>
    %122 = tpu.matmul %106, %121, %cst_101 {dimension_numbers = #tpu.dot_dimension_numbers<[1], [0], [0], [1], [0, 0, 1, 1], [], []>} : vector<16x128xbf16>, vector<128x128xbf16>, vector<16x128xf32> -> vector<16x128xf32>
    %c2_102 = arith.constant 2 : index
    %c0_103 = arith.constant 0 : index
    %c0_104 = arith.constant 0 : index
    %123 = vector.load %arg7[%c2_102, %c0_103, %c0_104] : memref<4x32x16xf32, #tpu.memory_space<vmem>>, vector<1x32x16xf32>
    %124 = vector.shape_cast %123 : vector<1x32x16xf32> to vector<32x16xf32>
    %cst_105 = arith.constant dense<0.000000e+00> : vector<32x128xf32>
    %125 = tpu.matmul %124, %122, %cst_105 {dimension_numbers = #tpu.dot_dimension_numbers<[1], [0], [0], [1], [0, 0, 1, 1], [], []>} : vector<32x16xf32>, vector<16x128xf32>, vector<32x128xf32> -> vector<32x128xf32>
    %126 = arith.addf %119, %125 : vector<32x128xf32>
    %c3_106 = arith.constant 3 : index
    %c0_107 = arith.constant 0 : index
    %c0_108 = arith.constant 0 : index
    %127 = vector.load %arg4[%c3_106, %c0_107, %c0_108] : memref<4x128x128xbf16, #tpu.memory_space<vmem>>, vector<1x128x128xbf16>
    %128 = vector.shape_cast %127 : vector<1x128x128xbf16> to vector<128x128xbf16>
    %cst_109 = arith.constant dense<0.000000e+00> : vector<16x128xf32>
    %129 = tpu.matmul %106, %128, %cst_109 {dimension_numbers = #tpu.dot_dimension_numbers<[1], [0], [0], [1], [0, 0, 1, 1], [], []>} : vector<16x128xbf16>, vector<128x128xbf16>, vector<16x128xf32> -> vector<16x128xf32>
    %c3_110 = arith.constant 3 : index
    %c0_111 = arith.constant 0 : index
    %c0_112 = arith.constant 0 : index
    %130 = vector.load %arg7[%c3_110, %c0_111, %c0_112] : memref<4x32x16xf32, #tpu.memory_space<vmem>>, vector<1x32x16xf32>
    %131 = vector.shape_cast %130 : vector<1x32x16xf32> to vector<32x16xf32>
    %cst_113 = arith.constant dense<0.000000e+00> : vector<32x128xf32>
    %132 = tpu.matmul %131, %129, %cst_113 {dimension_numbers = #tpu.dot_dimension_numbers<[1], [0], [0], [1], [0, 0, 1, 1], [], []>} : vector<32x16xf32>, vector<16x128xf32>, vector<32x128xf32> -> vector<32x128xf32>
    %133 = arith.addf %126, %132 : vector<32x128xf32>
    %c0_114 = arith.constant 0 : index
    %c0_115 = arith.constant 0 : index
    %c0_116 = arith.constant 0 : index
    %134 = vector.load %arg17[%c0_114, %c0_115, %c0_116] : memref<2x1x8xf32, #tpu.memory_space<vmem>>, vector<1x1x8xf32>
    %135 = vector.shape_cast %134 : vector<1x1x8xf32> to vector<1x8xf32>
    %c1_117 = arith.constant 1 : index
    %c0_118 = arith.constant 0 : index
    %c0_119 = arith.constant 0 : index
    %136 = vector.load %arg17[%c1_117, %c0_118, %c0_119] : memref<2x1x8xf32, #tpu.memory_space<vmem>>, vector<1x1x8xf32>
    %137 = vector.shape_cast %136 : vector<1x1x8xf32> to vector<1x8xf32>
    %cst_120 = arith.constant dense<0.000000e+00> : vector<128xf32>
    %138 = vector.multi_reduction <add>, %133, %cst_120 [0] : vector<32x128xf32> to vector<128xf32>
    %139 = vector.shape_cast %138 : vector<128xf32> to vector<1x128xf32>
    %140 = arith.mulf %133, %133 : vector<32x128xf32>
    %cst_121 = arith.constant dense<0.000000e+00> : vector<128xf32>
    %141 = vector.multi_reduction <add>, %140, %cst_121 [0] : vector<32x128xf32> to vector<128xf32>
    %142 = vector.shape_cast %141 : vector<128xf32> to vector<1x128xf32>
    %c0_122 = arith.constant 0 : index
    %c0_123 = arith.constant 0 : index
    %143 = vector.load %arg15[%c0_122, %c0_123] : memref<128x8xf32, #tpu.memory_space<vmem>>, vector<128x8xf32>
    %cst_124 = arith.constant dense<0.000000e+00> : vector<1x8xf32>
    %144 = tpu.matmul %139, %143, %cst_124 {dimension_numbers = #tpu.dot_dimension_numbers<[1], [0], [0], [1], [0, 0, 1, 1], [], []>} : vector<1x128xf32>, vector<128x8xf32>, vector<1x8xf32> -> vector<1x8xf32>
    %c0_125 = arith.constant 0 : index
    %c0_126 = arith.constant 0 : index
    %145 = vector.load %arg15[%c0_125, %c0_126] : memref<128x8xf32, #tpu.memory_space<vmem>>, vector<128x8xf32>
    %cst_127 = arith.constant dense<0.000000e+00> : vector<1x8xf32>
    %146 = tpu.matmul %142, %145, %cst_127 {dimension_numbers = #tpu.dot_dimension_numbers<[1], [0], [0], [1], [0, 0, 1, 1], [], []>} : vector<1x128xf32>, vector<128x8xf32>, vector<1x8xf32> -> vector<1x8xf32>
    %cst_128 = arith.constant 0.001953125 : f32
    %147 = vector.broadcast %cst_128 : f32 to vector<1x8xf32>
    %148 = arith.mulf %144, %147 : vector<1x8xf32>
    %cst_129 = arith.constant 0.001953125 : f32
    %149 = vector.broadcast %cst_129 : f32 to vector<1x8xf32>
    %150 = arith.mulf %146, %149 : vector<1x8xf32>
    %151 = arith.mulf %148, %148 : vector<1x8xf32>
    %152 = arith.subf %150, %151 : vector<1x8xf32>
    %cst_130 = arith.constant 0.000000e+00 : f32
    %153 = vector.broadcast %cst_130 : f32 to vector<1x8xf32>
    %154 = arith.maximumf %152, %153 : vector<1x8xf32>
    %cst_131 = arith.constant 9.99999974E-6 : f32
    %155 = vector.broadcast %cst_131 : f32 to vector<1x8xf32>
    %156 = arith.addf %154, %155 : vector<1x8xf32>
    %157 = math.rsqrt %156 : vector<1x8xf32>
    %158 = arith.mulf %135, %157 : vector<1x8xf32>
    %159 = arith.mulf %148, %158 : vector<1x8xf32>
    %160 = arith.subf %137, %159 : vector<1x8xf32>
    %c0_132 = arith.constant 0 : index
    %c0_133 = arith.constant 0 : index
    %161 = vector.load %arg16[%c0_132, %c0_133] : memref<8x128xf32, #tpu.memory_space<vmem>>, vector<8x128xf32>
    %cst_134 = arith.constant dense<0.000000e+00> : vector<1x128xf32>
    %162 = tpu.matmul %158, %161, %cst_134 {dimension_numbers = #tpu.dot_dimension_numbers<[1], [0], [0], [1], [0, 0, 1, 1], [], []>} : vector<1x8xf32>, vector<8x128xf32>, vector<1x128xf32> -> vector<1x128xf32>
    %c0_135 = arith.constant 0 : index
    %c0_136 = arith.constant 0 : index
    %163 = vector.load %arg16[%c0_135, %c0_136] : memref<8x128xf32, #tpu.memory_space<vmem>>, vector<8x128xf32>
    %cst_137 = arith.constant dense<0.000000e+00> : vector<1x128xf32>
    %164 = tpu.matmul %160, %163, %cst_137 {dimension_numbers = #tpu.dot_dimension_numbers<[1], [0], [0], [1], [0, 0, 1, 1], [], []>} : vector<1x8xf32>, vector<8x128xf32>, vector<1x128xf32> -> vector<1x128xf32>
    %165 = vector.broadcast %162 : vector<1x128xf32> to vector<32x128xf32>
    %166 = arith.mulf %133, %165 : vector<32x128xf32>
    %167 = vector.broadcast %164 : vector<1x128xf32> to vector<32x128xf32>
    %168 = arith.addf %166, %167 : vector<32x128xf32>
    %cst_138 = arith.constant 0.000000e+00 : f32
    %169 = vector.broadcast %cst_138 : f32 to vector<32x128xf32>
    %170 = arith.maximumf %168, %169 : vector<32x128xf32>
    %171 = arith.truncf %170 : vector<32x128xf32> to vector<32x128xbf16>
    %c0_139 = arith.constant 0 : index
    %c0_140 = arith.constant 0 : index
    %c0_141 = arith.constant 0 : index
    %172 = vector.load %arg5[%c0_139, %c0_140, %c0_141] : memref<4x128x32xbf16, #tpu.memory_space<vmem>>, vector<1x128x32xbf16>
    %173 = vector.shape_cast %172 : vector<1x128x32xbf16> to vector<128x32xbf16>
    %cst_142 = arith.constant dense<0.000000e+00> : vector<32x32xf32>
    %174 = tpu.matmul %171, %173, %cst_142 {dimension_numbers = #tpu.dot_dimension_numbers<[1], [0], [0], [1], [0, 0, 1, 1], [], []>} : vector<32x128xbf16>, vector<128x32xbf16>, vector<32x32xf32> -> vector<32x32xf32>
    %c0_143 = arith.constant 0 : index
    %c0_144 = arith.constant 0 : index
    %c0_145 = arith.constant 0 : index
    %175 = vector.load %arg8[%c0_143, %c0_144, %c0_145] : memref<4x64x32xf32, #tpu.memory_space<vmem>>, vector<1x64x32xf32>
    %176 = vector.shape_cast %175 : vector<1x64x32xf32> to vector<64x32xf32>
    %cst_146 = arith.constant dense<0.000000e+00> : vector<64x32xf32>
    %177 = tpu.matmul %176, %174, %cst_146 {dimension_numbers = #tpu.dot_dimension_numbers<[1], [0], [0], [1], [0, 0, 1, 1], [], []>} : vector<64x32xf32>, vector<32x32xf32>, vector<64x32xf32> -> vector<64x32xf32>
    %c1_147 = arith.constant 1 : index
    %c0_148 = arith.constant 0 : index
    %c0_149 = arith.constant 0 : index
    %178 = vector.load %arg5[%c1_147, %c0_148, %c0_149] : memref<4x128x32xbf16, #tpu.memory_space<vmem>>, vector<1x128x32xbf16>
    %179 = vector.shape_cast %178 : vector<1x128x32xbf16> to vector<128x32xbf16>
    %cst_150 = arith.constant dense<0.000000e+00> : vector<32x32xf32>
    %180 = tpu.matmul %171, %179, %cst_150 {dimension_numbers = #tpu.dot_dimension_numbers<[1], [0], [0], [1], [0, 0, 1, 1], [], []>} : vector<32x128xbf16>, vector<128x32xbf16>, vector<32x32xf32> -> vector<32x32xf32>
    %c1_151 = arith.constant 1 : index
    %c0_152 = arith.constant 0 : index
    %c0_153 = arith.constant 0 : index
    %181 = vector.load %arg8[%c1_151, %c0_152, %c0_153] : memref<4x64x32xf32, #tpu.memory_space<vmem>>, vector<1x64x32xf32>
    %182 = vector.shape_cast %181 : vector<1x64x32xf32> to vector<64x32xf32>
    %cst_154 = arith.constant dense<0.000000e+00> : vector<64x32xf32>
    %183 = tpu.matmul %182, %180, %cst_154 {dimension_numbers = #tpu.dot_dimension_numbers<[1], [0], [0], [1], [0, 0, 1, 1], [], []>} : vector<64x32xf32>, vector<32x32xf32>, vector<64x32xf32> -> vector<64x32xf32>
    %184 = arith.addf %177, %183 : vector<64x32xf32>
    %c2_155 = arith.constant 2 : index
    %c0_156 = arith.constant 0 : index
    %c0_157 = arith.constant 0 : index
    %185 = vector.load %arg5[%c2_155, %c0_156, %c0_157] : memref<4x128x32xbf16, #tpu.memory_space<vmem>>, vector<1x128x32xbf16>
    %186 = vector.shape_cast %185 : vector<1x128x32xbf16> to vector<128x32xbf16>
    %cst_158 = arith.constant dense<0.000000e+00> : vector<32x32xf32>
    %187 = tpu.matmul %171, %186, %cst_158 {dimension_numbers = #tpu.dot_dimension_numbers<[1], [0], [0], [1], [0, 0, 1, 1], [], []>} : vector<32x128xbf16>, vector<128x32xbf16>, vector<32x32xf32> -> vector<32x32xf32>
    %c2_159 = arith.constant 2 : index
    %c0_160 = arith.constant 0 : index
    %c0_161 = arith.constant 0 : index
    %188 = vector.load %arg8[%c2_159, %c0_160, %c0_161] : memref<4x64x32xf32, #tpu.memory_space<vmem>>, vector<1x64x32xf32>
    %189 = vector.shape_cast %188 : vector<1x64x32xf32> to vector<64x32xf32>
    %cst_162 = arith.constant dense<0.000000e+00> : vector<64x32xf32>
    %190 = tpu.matmul %189, %187, %cst_162 {dimension_numbers = #tpu.dot_dimension_numbers<[1], [0], [0], [1], [0, 0, 1, 1], [], []>} : vector<64x32xf32>, vector<32x32xf32>, vector<64x32xf32> -> vector<64x32xf32>
    %191 = arith.addf %184, %190 : vector<64x32xf32>
    %c3_163 = arith.constant 3 : index
    %c0_164 = arith.constant 0 : index
    %c0_165 = arith.constant 0 : index
    %192 = vector.load %arg5[%c3_163, %c0_164, %c0_165] : memref<4x128x32xbf16, #tpu.memory_space<vmem>>, vector<1x128x32xbf16>
    %193 = vector.shape_cast %192 : vector<1x128x32xbf16> to vector<128x32xbf16>
    %cst_166 = arith.constant dense<0.000000e+00> : vector<32x32xf32>
    %194 = tpu.matmul %171, %193, %cst_166 {dimension_numbers = #tpu.dot_dimension_numbers<[1], [0], [0], [1], [0, 0, 1, 1], [], []>} : vector<32x128xbf16>, vector<128x32xbf16>, vector<32x32xf32> -> vector<32x32xf32>
    %c3_167 = arith.constant 3 : index
    %c0_168 = arith.constant 0 : index
    %c0_169 = arith.constant 0 : index
    %195 = vector.load %arg8[%c3_167, %c0_168, %c0_169] : memref<4x64x32xf32, #tpu.memory_space<vmem>>, vector<1x64x32xf32>
    %196 = vector.shape_cast %195 : vector<1x64x32xf32> to vector<64x32xf32>
    %cst_170 = arith.constant dense<0.000000e+00> : vector<64x32xf32>
    %197 = tpu.matmul %196, %194, %cst_170 {dimension_numbers = #tpu.dot_dimension_numbers<[1], [0], [0], [1], [0, 0, 1, 1], [], []>} : vector<64x32xf32>, vector<32x32xf32>, vector<64x32xf32> -> vector<64x32xf32>
    %198 = arith.addf %191, %197 : vector<64x32xf32>
    %199 = math.tanh %198 : vector<64x32xf32>
    %c0_171 = arith.constant 0 : index
    %c0_172 = arith.constant 0 : index
    %200 = vector.load %arg18[%c0_171, %c0_172] : memref<64x32xf32, #tpu.memory_space<vmem>>, vector<64x32xf32>
    tpu.vector_store %arg18[%c0_171, %c0_172], %199 {strides = array<i32>} : memref<64x32xf32, #tpu.memory_space<vmem>>, vector<64x32xf32>,
    return
  }
  func.func @transform_0(%arg0: i32) -> (i32, i32) {
    %c0_i32 = arith.constant 0 : i32
    %c0_i32_0 = arith.constant 0 : i32
    %c0_i32_1 = arith.constant 0 : i32
    return %c0_i32, %c0_i32_0 : i32, i32
  }
  func.func @transform_1(%arg0: i32) -> (i32, i32) {
    %c0_i32 = arith.constant 0 : i32
    %c0_i32_0 = arith.constant 0 : i32
    %c0_i32_1 = arith.constant 0 : i32
    return %c0_i32, %c0_i32_0 : i32, i32
  }
  func.func @transform_2(%arg0: i32) -> (i32, i32, i32) {
    %c0_i32 = arith.constant 0 : i32
    %c0_i32_0 = arith.constant 0 : i32
    %c0_i32_1 = arith.constant 0 : i32
    %c0_i32_2 = arith.constant 0 : i32
    return %c0_i32, %c0_i32_0, %c0_i32_1 : i32, i32, i32
  }
  func.func @transform_3(%arg0: i32) -> (i32, i32, i32) {
    %c0_i32 = arith.constant 0 : i32
    %c0_i32_0 = arith.constant 0 : i32
    %c0_i32_1 = arith.constant 0 : i32
    %c0_i32_2 = arith.constant 0 : i32
    return %c0_i32, %c0_i32_0, %c0_i32_1 : i32, i32, i32
  }
  func.func @transform_4(%arg0: i32) -> (i32, i32, i32) {
    %c0_i32 = arith.constant 0 : i32
    %c0_i32_0 = arith.constant 0 : i32
    %c0_i32_1 = arith.constant 0 : i32
    %c0_i32_2 = arith.constant 0 : i32
    return %c0_i32, %c0_i32_0, %c0_i32_1 : i32, i32, i32
  }
  func.func @transform_5(%arg0: i32) -> (i32, i32, i32) {
    %c0_i32 = arith.constant 0 : i32
    %c0_i32_0 = arith.constant 0 : i32
    %c0_i32_1 = arith.constant 0 : i32
    %c0_i32_2 = arith.constant 0 : i32
    return %c0_i32, %c0_i32_0, %c0_i32_1 : i32, i32, i32
  }
  func.func @transform_6(%arg0: i32) -> (i32, i32, i32) {
    %c0_i32 = arith.constant 0 : i32
    %c0_i32_0 = arith.constant 0 : i32
    %c0_i32_1 = arith.constant 0 : i32
    %c0_i32_2 = arith.constant 0 : i32
    return %c0_i32, %c0_i32_0, %c0_i32_1 : i32, i32, i32
  }
  func.func @transform_7(%arg0: i32) -> (i32, i32, i32) {
    %c0_i32 = arith.constant 0 : i32
    %c0_i32_0 = arith.constant 0 : i32
    %c0_i32_1 = arith.constant 0 : i32
    %c0_i32_2 = arith.constant 0 : i32
    return %c0_i32, %c0_i32_0, %c0_i32_1 : i32, i32, i32
  }
  func.func @transform_8(%arg0: i32) -> (i32, i32) {
    %c0_i32 = arith.constant 0 : i32
    %c0_i32_0 = arith.constant 0 : i32
    %c0_i32_1 = arith.constant 0 : i32
    return %c0_i32, %c0_i32_0 : i32, i32
  }
  func.func @transform_9(%arg0: i32) -> (i32, i32) {
    %c0_i32 = arith.constant 0 : i32
    %c0_i32_0 = arith.constant 0 : i32
    %c0_i32_1 = arith.constant 0 : i32
    return %c0_i32, %c0_i32_0 : i32, i32
  }
  func.func @transform_10(%arg0: i32) -> (i32, i32, i32) {
    %c0_i32 = arith.constant 0 : i32
    %c0_i32_0 = arith.constant 0 : i32
    %c0_i32_1 = arith.constant 0 : i32
    %c0_i32_2 = arith.constant 0 : i32
    return %c0_i32, %c0_i32_0, %c0_i32_1 : i32, i32, i32
  }
  func.func @transform_11(%arg0: i32) -> (i32, i32) {
    %c0_i32 = arith.constant 0 : i32
    %c0_i32_0 = arith.constant 0 : i32
    %c0_i32_1 = arith.constant 0 : i32
    return %c0_i32, %c0_i32_0 : i32, i32
  }
  func.func @transform_12(%arg0: i32) -> (i32, i32) {
    %c0_i32 = arith.constant 0 : i32
    %c0_i32_0 = arith.constant 0 : i32
    %c0_i32_1 = arith.constant 0 : i32
    return %c0_i32, %c0_i32_0 : i32, i32
  }
  func.func @transform_13(%arg0: i32) -> (i32, i32, i32) {
    %c0_i32 = arith.constant 0 : i32
    %c0_i32_0 = arith.constant 0 : i32
    %c0_i32_1 = arith.constant 0 : i32
    %c0_i32_2 = arith.constant 0 : i32
    return %c0_i32, %c0_i32_0, %c0_i32_1 : i32, i32, i32
  }
  func.func @transform_14(%arg0: i32) -> (i32, i32) {
    %c0_i32 = arith.constant 0 : i32
    %c0_i32_0 = arith.constant 0 : i32
    %c0_i32_1 = arith.constant 0 : i32
    return %c0_i32, %c0_i32_0 : i32, i32
  }
  func.func @transform_15(%arg0: i32) -> (i32, i32) {
    %c0_i32 = arith.constant 0 : i32
    %c0_i32_0 = arith.constant 0 : i32
    %c0_i32_1 = arith.constant 0 : i32
    return %c0_i32, %c0_i32_0 : i32, i32
  }
  func.func @transform_16(%arg0: i32) -> (i32, i32, i32) {
    %c0_i32 = arith.constant 0 : i32
    %c0_i32_0 = arith.constant 0 : i32
    %c0_i32_1 = arith.constant 0 : i32
    %c0_i32_2 = arith.constant 0 : i32
    return %c0_i32, %c0_i32_0, %c0_i32_1 : i32, i32, i32
  }
  func.func @transform_17(%arg0: i32) -> (i32, i32) {
    %c0_i32 = arith.constant 0 : i32
    %c0_i32_0 = arith.constant 0 : i32
    %c0_i32_1 = arith.constant 0 : i32
    return %c0_i32, %c0_i32_0 : i32, i32
  }
}

</mosaic_0001>

<bundles_post_ra>
// kernel: generator_forward.1
= control target key start
LH: loop header
LB: loop body
LE: loop exit
PB: predicated region body
PF: predicated region fallthrough
CT: control target
= control target key end

     0   :  { %vm91_vm0 = vcmask 523264   ;;  %vm203_vm4 = vcmask 261120   ;;  %vm416_vm5 = vcmask 64512   ;;  %vm795_vm9 = vcmask 130048   ;;  %s3859_s1 = inlined_call_operand.vmem [shape: bf16[64,128], index: 1, kind: input, shape index: {}]   ;;  %s3860_s8 = inlined_call_operand.vmem [shape: f32[128,32], index: 8, kind: input, shape index: {}]   ;;  %s3861_s0 = inlined_call_operand.vmem [shape: f32[8,64], index: 0, kind: input, shape index: {}]   ;;  %s3862_s9 = inlined_call_operand.vmem [shape: f32[32,128], index: 9, kind: input, shape index: {}]   ;;  %s3863_s2 = inlined_call_operand.vmem [shape: bf16[4,128,128], index: 2, kind: input, shape index: {}]   ;;  %s3864_s10 = inlined_call_operand.vmem [shape: f32[2,1,32], index: 10, kind: input, shape index: {}]   ;;  %s3865_s5 = inlined_call_operand.vmem [shape: f32[4,16,8], index: 5, kind: input, shape index: {}]   ;;  %s3866_s11 = inlined_call_operand.vmem [shape: f32[128,16], index: 11, kind: input, shape index: {}]   ;;  %s3867_s12 = inlined_call_operand.vmem [shape: f32[16,128], index: 12, kind: input, shape index: {}]   ;;  %s3868_s3 = inlined_call_operand.vmem [shape: bf16[4,128,128], index: 3, kind: input, shape index: {}]   ;;  %s3869_s13 = inlined_call_operand.vmem [shape: f32[2,1,16], index: 13, kind: input, shape index: {}]   ;;  %s3870_s6 = inlined_call_operand.vmem [shape: f32[4,32,16], index: 6, kind: input, shape index: {}]   ;;  %s3871_s14 = inlined_call_operand.vmem [shape: f32[128,8], index: 14, kind: input, shape index: {}]   ;;  %s3872_s15 = inlined_call_operand.vmem [shape: f32[8,128], index: 15, kind: input, shape index: {}]   ;;  %s3873_s4 = inlined_call_operand.vmem [shape: bf16[4,128,32], index: 4, kind: input, shape index: {}]   ;;  %s3874_s16 = inlined_call_operand.vmem [shape: f32[2,1,8], index: 16, kind: input, shape index: {}]   ;;  %s3875_s7 = inlined_call_operand.vmem [shape: f32[4,64,32], index: 7, kind: input, shape index: {}]   ;;  %s3876_s17 = inlined_call_operand.vmem [shape: f32[64,32], index: 17, kind: output, shape index: {}]  }
   0x1   :  { %3880 = sst [smem:[#allocation2_spill]] %s3859_s1  ;;  %v57_v10 = vld [vmem:[%s3861_s0] sm:$0xff]  ;;  %v202_v37 = vld [vmem:[%s3862_s9 + $0x18] sm:$0xff]  ;;  %v201_v38 = vld [vmem:[%s3862_s9 + $0x10] sm:$0xff] }
   0x2   :  { %3881 = sst [smem:[#allocation3_spill]] %s3860_s8  ;;  %v58_v12 = vpack.c.bf16 %v57_v10, %v57_v10  ;;  %242 = vmatpush.msra.mxu3 %v202_v37  ;;  %v200_v39 = vld [vmem:[%s3862_s9 + $0x8] sm:$0xff]  ;;  %v199_v40 = vld [vmem:[%s3862_s9] sm:$0xff]  ;;  %v2849_v46 = vld [vmem:[%s3863_s2 + $0x38] sm:$0xff] }
   0x3   :  { %3882 = sst [smem:[#allocation4_spill]] %s3871_s14  ;;  %v2857_v47 = vld [vmem:[%s3863_s2 + $0x78] sm:$0xff]  ;;  %v2848_v49 = vld [vmem:[%s3863_s2 + $0x30] sm:$0xff]  ;;  %v2847_v53 = vld [vmem:[%s3863_s2 + $0x28] sm:$0xff] }
   0x4   :  { %s3883_s26 = sld [smem:[#allocation2_spill]]  ;;  %243 = vmatpush.msra.mxu3 %v201_v38  ;;  %v2856_v50 = vld [vmem:[%s3863_s2 + $0x70] sm:$0xff]  ;;  %v2855_v54 = vld [vmem:[%s3863_s2 + $0x68] sm:$0xff]  ;;  %v2846_v55 = vld [vmem:[%s3863_s2 + $0x20] sm:$0xff] }
   0x5   :  { %s3884_s14 = sld [smem:[#allocation3_spill]]  ;;  %v2854_v56 = vld [vmem:[%s3863_s2 + $0x60] sm:$0xff]  ;;  %v2845_v58 = vld [vmem:[%s3863_s2 + $0x18] sm:$0xff]  ;;  %v2851_v10 = vld [vmem:[%s3863_s2 + $0x48] sm:$0xff] }
   0x6   :  { %244 = vmatpush.msra.mxu3 %v200_v39  ;;  %v2853_v59 = vld [vmem:[%s3863_s2 + $0x58] sm:$0xff]  ;;  %s3885_s19 = sld [smem:[#allocation4_spill]] }
   0x8   :  { %245 = vmatpush.msra.mxu3 %v199_v40 }
   0xa   :  { %v2841_v0 = vld [vmem:[%s3883_s26 + $0x18] sm:$0xff]  ;;  %v2840_v2 = vld [vmem:[%s3883_s26 + $0x10] sm:$0xff]  ;;  %v2839_v6 = vld [vmem:[%s3883_s26 + $0x8] sm:$0xff]  ;;  %400 = vmatpush.bf16.msrb.mxu3 %v2857_v47 }
   0xb   :  { %v139_v1 = vld [vmem:[%s3884_s14 + $0x78] sm:$0xff]  ;;  %99 = vmatpush.bf16.msra.mxu0 %v2841_v0  ;;  %v138_v3 = vld [vmem:[%s3884_s14 + $0x70] sm:$0xff]  ;;  %v137_v4 = vld [vmem:[%s3884_s14 + $0x68] sm:$0xff] }
   0xc   :  { %140 = vmatpush.msra.mxu1 %v139_v1  ;;  %160 = vmatpush.msra.mxu2 %v139_v1  ;;  %v136_v5 = vld [vmem:[%s3884_s14 + $0x60] sm:$0xff]  ;;  %v135_v7 = vld [vmem:[%s3884_s14 + $0x58] sm:$0xff]  ;;  %v134_v8 = vld [vmem:[%s3884_s14 + $0x50] sm:$0xff] }
   0xd   :  { %v2838_v9 = vld [vmem:[%s3883_s26] sm:$0xff]  ;;  %v133_v11 = vld [vmem:[%s3884_s14 + $0x48] sm:$0xff]  ;;  %v131_v14 = vld [vmem:[%s3884_s14 + $0x38] sm:$0xff] }
   0xe   :  { %141 = vmatpush.msra.mxu1 %v138_v3  ;;  %161 = vmatpush.msra.mxu2 %v138_v3  ;;  %v132_v13 = vld [vmem:[%s3884_s14 + $0x40] sm:$0xff]  ;;  %v130_v15 = vld [vmem:[%s3884_s14 + $0x30] sm:$0xff]  ;;  %v129_v16 = vld [vmem:[%s3884_s14 + $0x28] sm:$0xff] }
   0xf   :  { %100 = vmatpush.bf16.msra.mxu0 %v2840_v2  ;;  %v128_v17 = vld [vmem:[%s3884_s14 + $0x20] sm:$0xff]  ;;  %v127_v18 = vld [vmem:[%s3884_s14 + $0x18] sm:$0xff]  ;;  %v126_v19 = vld [vmem:[%s3884_s14 + $0x10] sm:$0xff]  ;;  %401 = vmatpush.bf16.msrb.mxu3 %v2856_v50 }
  0x10   :  { %142 = vmatpush.msra.mxu1 %v137_v4  ;;  %162 = vmatpush.msra.mxu2 %v137_v4  ;;  %v125_v20 = vld [vmem:[%s3884_s14 + $0x8] sm:$0xff]  ;;  %v124_v21 = vld [vmem:[%s3884_s14] sm:$0xff] }
  0x11   :  { %v108_v0 = vld [vmem:[%s3864_s10] sm:$0x1]  ;;  %v2203_v4 = vld [vmem:[%s3864_s10 + $0x1] sm:$0x1] }
  0x12   :  { %143 = vmatpush.msra.mxu1 %v136_v5  ;;  %163 = vmatpush.msra.mxu2 %v136_v5  ;;  %v2340_v47 = vld [vmem:[%s3865_s5 + $0x20] sm:$0xff] }
  0x13   :  { %101 = vmatpush.bf16.msra.mxu0 %v2839_v6  ;;  %402 = vmatpush.bf16.msrb.mxu3 %v2855_v54 }
  0x14   :  { %144 = vmatpush.msra.mxu1 %v135_v7  ;;  %164 = vmatpush.msra.mxu2 %v135_v7  ;;  %v2844_v7 = vld [vmem:[%s3863_s2 + $0x10] sm:$0xff] }
  0x16   :  { %145 = vmatpush.msra.mxu1 %v134_v8  ;;  %165 = vmatpush.msra.mxu2 %v134_v8  ;;  %v2852_v8 = vld [vmem:[%s3863_s2 + $0x50] sm:$0xff] }
  0x17   :  { %102 = vmatpush.bf16.msra.mxu0 %v2838_v9  ;;  %403 = vmatpush.bf16.msrb.mxu3 %v2854_v56  ;;  %v2843_v9 = vld [vmem:[%s3863_s2 + $0x8] sm:$0xff]  ;;  %v732_v56 = vld [vmem:[%s3866_s11 + $0x70] sm:$0xff] }
  0x18   :  { %146 = vmatpush.msra.mxu1 %v133_v11  ;;  %166 = vmatpush.msra.mxu2 %v133_v11  ;;  %v2842_v11 = vld [vmem:[%s3863_s2] sm:$0xff] }
  0x1a   :  { %147 = vmatpush.msra.mxu1 %v132_v13  ;;  %2202 = vmatmul.msk.bf16.vlgmr.msra.gmra.mxu0 %vm91_vm0, %v58_v12  ;;  %v2850_v12 = vld [vmem:[%s3863_s2 + $0x40] sm:$0xff] }
  0x1b   :  { %167 = vmatpush.msra.mxu2 %v132_v13  ;;  %320 = vmatpush.bf16.msrb.mxu0 %v2849_v46 }
  0x1c   :  { %148 = vmatpush.msra.mxu1 %v131_v14  ;;  %404 = vmatpush.bf16.msrb.mxu3 %v2853_v59  ;;  %v729_v59 = vld [vmem:[%s3866_s11 + $0x58] sm:$0xff] }
  0x1d   :  { %168 = vmatpush.msra.mxu2 %v131_v14 }
  0x1e   :  { %149 = vmatpush.msra.mxu1 %v130_v15 }
  0x1f   :  { %169 = vmatpush.msra.mxu2 %v130_v15  ;;  %321 = vmatpush.bf16.msrb.mxu0 %v2848_v49  ;;  %v2341_v49 = vld [vmem:[%s3865_s5 + $0x28] sm:$0xff] }
  0x20   :  { %150 = vmatpush.msra.mxu1 %v129_v16  ;;  %405 = vmatpush.bf16.msrb.mxu3 %v2852_v8  ;;  %v718_v8 = vld [vmem:[%s3866_s11] sm:$0xff] }
  0x21   :  { %170 = vmatpush.msra.mxu2 %v129_v16 }
  0x22   :  { %151 = vmatpush.msra.mxu1 %v128_v17 }
  0x23   :  { %171 = vmatpush.msra.mxu2 %v128_v17  ;;  %322 = vmatpush.bf16.msrb.mxu0 %v2847_v53  ;;  %v2393_v53 = vld [vmem:[%s3865_s5 + $0x38] sm:$0xff] }
  0x24   :  { %152 = vmatpush.msra.mxu1 %v127_v18  ;;  %406 = vmatpush.bf16.msrb.mxu3 %v2851_v10 }
  0x25   :  { %172 = vmatpush.msra.mxu2 %v127_v18 }
  0x26   :  { %153 = vmatpush.msra.mxu1 %v126_v19 }
  0x27   :  { %173 = vmatpush.msra.mxu2 %v126_v19  ;;  %323 = vmatpush.bf16.msrb.mxu0 %v2846_v55  ;;  %v733_v55 = vld [vmem:[%s3866_s11 + $0x78] sm:$0xff] }
  0x28   :  { %154 = vmatpush.msra.mxu1 %v125_v20  ;;  %407 = vmatpush.bf16.msrb.mxu3 %v2850_v12 }
  0x29   :  { %174 = vmatpush.msra.mxu2 %v125_v20 }
  0x2a   :  { %155 = vmatpush.msra.mxu1 %v124_v21 }
  0x2b   :  { %175 = vmatpush.msra.mxu2 %v124_v21  ;;  %324 = vmatpush.bf16.msrb.mxu0 %v2845_v58  ;;  %v333_v21 = vld [vmem:[%s3865_s5] sm:$0xff] }
  0x2c   :  { %v730_v58 = vld [vmem:[%s3866_s11 + $0x60] sm:$0xff] }
  0x2d   :  { %219 = vmatpush.msrb.mxu2 %v202_v37  ;;  %v2873_v37 = vld [vmem:[%s3863_s2 + $0xf8] sm:$0xff] }
  0x2f   :  { %220 = vmatpush.msrb.mxu2 %v201_v38  ;;  %325 = vmatpush.bf16.msrb.mxu0 %v2844_v7  ;;  %v2872_v38 = vld [vmem:[%s3863_s2 + $0xf0] sm:$0xff]  ;;  %v719_v7 = vld [vmem:[%s3866_s11 + $0x8] sm:$0xff] }
  0x31   :  { %221 = vmatpush.msrb.mxu2 %v200_v39  ;;  %v2871_v39 = vld [vmem:[%s3863_s2 + $0xe8] sm:$0xff] }
  0x33   :  { %222 = vmatpush.msrb.mxu2 %v199_v40  ;;  %326 = vmatpush.bf16.msrb.mxu0 %v2843_v9  ;;  %v2870_v40 = vld [vmem:[%s3863_s2 + $0xe0] sm:$0xff] }
  0x37   :  { %327 = vmatpush.bf16.msrb.mxu0 %v2842_v11 }
  0x97   :  { %v3113_v22 = vpop.f32.mrf.mxu0 }
  0x98   :  { %v111_v23 = vrot.slane %v3113_v22, 4  ;;  %v117_v24 = vmul.f32 %v3113_v22, %v3113_v22 }
  0x9a   :  { %v112_v25 = vadd.f32 %v111_v23, %v3113_v22  ;;  %v118_v26 = vrot.slane %v117_v24, 4 }
  0x9c   :  { %v113_v27 = vrot.slane %v112_v25, 2  ;;  %v119_v28 = vadd.f32 %v118_v26, %v117_v24  ;;  %v2865_v24 = vld [vmem:[%s3863_s2 + $0xb8] sm:$0xff]  ;;  %v334_v26 = vld [vmem:[%s3865_s5 + $0x8] sm:$0xff] }
  0x9e   :  { %v114_v29 = vadd.f32 %v113_v27, %v112_v25  ;;  %v120_v30 = vrot.slane %v119_v28, 2  ;;  %v2286_v25 = vld [vmem:[%s3865_s5 + $0x10] sm:$0xff] }
  0x9f   :  { %v106_v31 = vpop.f32.mrf.mxu0 }
  0xa0   :  { %v115_v32 = vrot.slane %v114_v29, 1  ;;  %v121_v33 = vadd.f32 %v120_v30, %v119_v28  ;;  %v2864_v28 = vld [vmem:[%s3863_s2 + $0xb0] sm:$0xff]  ;;  %v2287_v31 = vld [vmem:[%s3865_s5 + $0x18] sm:$0xff] }
  0xa2   :  { %v116_v34 = vadd.f32 %v115_v32, %v114_v29  ;;  %v122_v35 = vrot.slane %v121_v33, 1  ;;  %v2863_v29 = vld [vmem:[%s3863_s2 + $0xa8] sm:$0xff]  ;;  %v2862_v32 = vld [vmem:[%s3863_s2 + $0xa0] sm:$0xff] }
  0xa4   :  { %156 = vmatmul.f32.vlgmr.msra.gmra.mxu1 %v116_v34  ;;  %v123_v36 = vadd.f32 %v122_v35, %v121_v33  ;;  %v2861_v33 = vld [vmem:[%s3863_s2 + $0x98] sm:$0xff]  ;;  %v2860_v34 = vld [vmem:[%s3863_s2 + $0x90] sm:$0xff]  ;;  %v2859_v35 = vld [vmem:[%s3863_s2 + $0x88] sm:$0xff] }
  0xa6   :  { %176 = vmatmul.f32.vlgmr.msra.gmra.mxu2 %v123_v36  ;;  %v2858_v36 = vld [vmem:[%s3863_s2 + $0x80] sm:$0xff] }
 0x121   :  { %v157_v41 = vpop.f32.mrf.mxu1 }
 0x122   :  { %v180_v42 = vmul.f32 0.03125, %v157_v41  ;;  %v2869_v41 = vld [vmem:[%s3863_s2 + $0xd8] sm:$0xff] }
 0x124   :  { %v182_v44 = vmul.f32 %v180_v42, %v180_v42 }
 0x129   :  { %v177_v43 = vpop.f32.mrf.mxu2 }
 0x12a   :  { %v181_v45 = vmul.f32 0.03125, %v177_v43  ;;  %v2867_v43 = vld [vmem:[%s3863_s2 + $0xc8] sm:$0xff] }
 0x12c   :  { %v183_v48 = vsub.f32 %v181_v45, %v182_v44  ;;  %v2866_v44 = vld [vmem:[%s3863_s2 + $0xc0] sm:$0xff] }
 0x12e   :  { %v184_v51 = vmax.f32 %v183_v48, 0.0 }
 0x130   :  { %v185_v52 = vadd.f32 1e-05, %v184_v51  ;;  %v2392_v51 = vld [vmem:[%s3865_s5 + $0x30] sm:$0xff] }
 0x132   :  { %2938 = vrsqrt.f32 %v185_v52  ;;  %vm192_vm2 = vweird.f32 %v185_v52 }
 0x138   :  { %v2939_v57 = vpop.eup %2938 }
 0x139   :  { %v187_v60 = vmul.f32 %v2939_v57, %v185_v52  ;;  %vm193_vm1 = vweird.f32 %v2939_v57 }
 0x13a   :  { %vm194_vm3 = vmor %vm192_vm2, %vm193_vm1 }
 0x13b   :  { %v188_v61 = vmul.f32 %v2939_v57, %v187_v60  ;;  %v728_v60 = vld [vmem:[%s3866_s11 + $0x50] sm:$0xff] }
 0x13d   :  { %v189_v62 = vmul.f32 0.5, %v188_v61  ;;  %v727_v61 = vld [vmem:[%s3866_s11 + $0x48] sm:$0xff] }
 0x13f   :  { %v190_v63 = vsub.f32 1.5, %v189_v62  ;;  %v726_v62 = vld [vmem:[%s3866_s11 + $0x40] sm:$0xff] }
 0x141   :  { %v191_v1 = vmul.f32 %v2939_v57, %v190_v63 }
 0x143   :  { %v195_v2 = vsel %vm194_vm3, %v2939_v57, %v191_v1  ;;  %v731_v57 = vld [vmem:[%s3866_s11 + $0x68] sm:$0xff]  ;;  %v724_v1 = vld [vmem:[%s3866_s11 + $0x30] sm:$0xff] }
 0x144   :  { %v196_v3 = vmul.f32 %v195_v2, %v108_v0  ;;  %v725_v0 = vld [vmem:[%s3866_s11 + $0x38] sm:$0xff]  ;;  %v723_v2 = vld [vmem:[%s3866_s11 + $0x28] sm:$0xff] }
 0x146   :  { %2204 = vmatmul.msk.f32.vlgmr.msrb.gmra.mxu2 %vm203_vm4, %v196_v3  ;;  %v197_v5 = vmul.f32 %v196_v3, %v180_v42  ;;  %v2868_v42 = vld [vmem:[%s3863_s2 + $0xd0] sm:$0xff]  ;;  %v722_v3 = vld [vmem:[%s3866_s11 + $0x20] sm:$0xff] }
 0x148   :  { %v198_v6 = vsub.f32 %v2203_v4, %v197_v5  ;;  %v721_v4 = vld [vmem:[%s3866_s11 + $0x18] sm:$0xff] }
 0x14a   :  { %2205 = vmatmul.msk.f32.vlgmr.msra.gmra.mxu3 %vm203_vm4, %v198_v6  ;;  %v720_v6 = vld [vmem:[%s3866_s11 + $0x10] sm:$0xff] }
 0x1c9   :  { %v224_v13 = vpop.f32.mrf.mxu2 }
 0x1ca   :  { %v250_v14 = vperm.slane %v224_v13, 0 }
 0x1cc   :  { %v251_v16 = vmul.f32 %v250_v14, %v3113_v22 }
 0x1cd   :  { %v247_v15 = vpop.f32.mrf.mxu3 }
 0x1ce   :  { %v252_v17 = vperm.slane %v247_v15, 0 }
 0x1d0   :  { %v253_v18 = vadd.f32 %v252_v17, %v251_v16 }
 0x1d2   :  { %v254_v19 = vmax.f32 %v253_v18, 0.0 }
 0x1d4   :  { %v255_v20 = vpack.c.bf16 %v254_v19, %v254_v19 }
 0x1d6   :  { %328 = vmatmul.bf16.vlgmr.msrb.gmra.mxu0 %v255_v20  ;;  %408 = vmatmul.bf16.vlgmr.msrb.gmra.mxu3 %v255_v20 }
 0x253   :  { %v329_v23 = vpop.f32.mrf.mxu0 }
 0x254   :  { %467 = vmatpush.msra.mxu2 %v329_v23 }
 0x255   :  { %2290 = vmatmul.msk.f32.vlgmr.msra.gmra.mxu2 %vm416_vm5, %v333_v21 }
 0x259   :  { %v409_v22 = vpop.f32.mrf.mxu3 }
 0x25a   :  { %438 = vmatpush.msrb.mxu1 %v409_v22 }
 0x25b   :  { %v331_v27 = vpop.f32.mrf.mxu0  ;;  %2288 = vmatmul.msk.f32.vlgmr.msrb.gmra.mxu1 %vm416_vm5, %v2286_v25 }
 0x25c   :  { %540 = vmatpush.bf16.msra.mxu1 %v2865_v24 }
 0x25d   :  { %2291 = vmatmul.msk.f32.gmra.mxu2 %vm416_vm5, %v334_v26 }
 0x260   :  { %541 = vmatpush.bf16.msra.mxu1 %v2864_v28 }
 0x261   :  { %v411_v30 = vpop.f32.mrf.mxu3 }
 0x263   :  { %2289 = vmatmul.msk.f32.gmra.mxu1 %vm416_vm5, %v2287_v31 }
 0x264   :  { %542 = vmatpush.bf16.msra.mxu1 %v2863_v29 }
 0x268   :  { %543 = vmatpush.bf16.msra.mxu1 %v2862_v32 }
 0x26c   :  { %544 = vmatpush.bf16.msra.mxu1 %v2861_v33 }
 0x270   :  { %545 = vmatpush.bf16.msra.mxu1 %v2860_v34 }
 0x274   :  { %546 = vmatpush.bf16.msra.mxu1 %v2859_v35  ;;  %v794_v35 = vld [vmem:[%s3867_s12 + $0x8] sm:$0xff] }
 0x275   :  { %836 = vmatpush.msra.mxu0 %v794_v35 }
 0x278   :  { %547 = vmatpush.bf16.msra.mxu1 %v2858_v36  ;;  %v793_v36 = vld [vmem:[%s3867_s12] sm:$0xff] }
 0x279   :  { %837 = vmatpush.msra.mxu0 %v793_v36 }
 0x27b   :  { %548 = vmatmul.bf16.vlgmr.msra.gmra.mxu1 %v255_v20 }
 0x27c   :  { %652 = vmatpush.bf16.msrb.mxu1 %v2873_v37 }
 0x280   :  { %653 = vmatpush.bf16.msrb.mxu1 %v2872_v38 }
 0x284   :  { %654 = vmatpush.bf16.msrb.mxu1 %v2871_v39 }
 0x288   :  { %655 = vmatpush.bf16.msrb.mxu1 %v2870_v40 }
 0x28c   :  { %656 = vmatpush.bf16.msrb.mxu1 %v2869_v41 }
 0x290   :  { %657 = vmatpush.bf16.msrb.mxu1 %v2868_v42  ;;  %v2881_v42 = vld [vmem:[%s3868_s3 + $0x38] sm:$0xff] }
 0x294   :  { %658 = vmatpush.bf16.msrb.mxu1 %v2867_v43  ;;  %v2889_v43 = vld [vmem:[%s3868_s3 + $0x78] sm:$0xff] }
 0x298   :  { %659 = vmatpush.bf16.msrb.mxu1 %v2866_v44 }
 0x29b   :  { %660 = vmatmul.bf16.vlgmr.msrb.gmra.mxu1 %v255_v20 }
 0x29c   :  { %813 = vmatpush.msra.mxu1 %v794_v35  ;;  %v931_v35 = vld [vmem:[%s3870_s6 + $0x10] sm:$0xff] }
 0x29e   :  { %814 = vmatpush.msra.mxu1 %v793_v36  ;;  %v2901_v36 = vld [vmem:[%s3868_s3 + $0xd8] sm:$0xff] }
 0x2a0   :  { %915 = vmatpush.bf16.msrb.mxu1 %v2881_v42  ;;  %v2899_v42 = vld [vmem:[%s3868_s3 + $0xc8] sm:$0xff] }
 0x2d8   :  { %v3252_v45 = vpop.f32.mrf.mxu1  ;;  %v469_v63 = vpop.f32.mrf.mxu2 }
 0x2d9   :  { %v470_v11 = vadd.f32 %v469_v63, %v3252_v45  ;;  %v2880_v45 = vld [vmem:[%s3868_s3 + $0x30] sm:$0xff] }
 0x2da   :  { %916 = vmatpush.bf16.msrb.mxu1 %v2880_v45  ;;  %v2482_v45 = vld [vmem:[%s3870_s6 + $0x38] sm:$0xff] }
 0x2e0   :  { %v3254_v46 = vpop.f32.mrf.mxu1  ;;  %v472_v5 = vpop.f32.mrf.mxu2 }
 0x2e1   :  { %v473_v13 = vadd.f32 %v472_v5, %v3254_v46  ;;  %v2888_v46 = vld [vmem:[%s3868_s3 + $0x70] sm:$0xff]  ;;  %v2875_v5 = vld [vmem:[%s3868_s3 + $0x8] sm:$0xff] }
 0x2f8   :  { %v549_v48 = vpop.f32.mrf.mxu1 }
 0x2f9   :  { %577 = vmatpush.msrb.mxu2 %v549_v48 }
 0x2fa   :  { %2342 = vmatmul.msk.f32.vlgmr.msrb.gmra.mxu2 %vm416_vm5, %v2340_v47 }
 0x2fb   :  { %734 = vmatpush.msra.mxu2 %v733_v55 }
 0x2fd   :  { %735 = vmatpush.msra.mxu2 %v732_v56 }
 0x2ff   :  { %736 = vmatpush.msra.mxu2 %v731_v57 }
 0x300   :  { %v551_v50 = vpop.f32.mrf.mxu1 }
 0x301   :  { %737 = vmatpush.msra.mxu2 %v730_v58  ;;  %v2887_v50 = vld [vmem:[%s3868_s3 + $0x68] sm:$0xff] }
 0x302   :  { %2343 = vmatmul.msk.f32.gmra.mxu2 %vm416_vm5, %v2341_v49  ;;  %v2879_v49 = vld [vmem:[%s3868_s3 + $0x28] sm:$0xff] }
 0x303   :  { %738 = vmatpush.msra.mxu2 %v729_v59  ;;  %917 = vmatpush.bf16.msrb.mxu1 %v2879_v49 }
 0x305   :  { %739 = vmatpush.msra.mxu2 %v728_v60 }
 0x307   :  { %740 = vmatpush.msra.mxu2 %v727_v61 }
 0x309   :  { %741 = vmatpush.msra.mxu2 %v726_v62 }
 0x30b   :  { %742 = vmatpush.msra.mxu2 %v725_v0 }
 0x30d   :  { %743 = vmatpush.msra.mxu2 %v724_v1 }
 0x30f   :  { %744 = vmatpush.msra.mxu2 %v723_v2 }
 0x311   :  { %745 = vmatpush.msra.mxu2 %v722_v3 }
 0x313   :  { %746 = vmatpush.msra.mxu2 %v721_v4 }
 0x315   :  { %747 = vmatpush.msra.mxu2 %v720_v6 }
 0x317   :  { %748 = vmatpush.msra.mxu2 %v719_v7 }
 0x318   :  { %v661_v52 = vpop.f32.mrf.mxu1 }
 0x319   :  { %689 = vmatpush.msra.mxu3 %v661_v52  ;;  %749 = vmatpush.msra.mxu2 %v718_v8  ;;  %v2886_v52 = vld [vmem:[%s3868_s3 + $0x60] sm:$0xff] }
 0x31a   :  { %2394 = vmatmul.msk.f32.vlgmr.msra.gmra.mxu3 %vm416_vm5, %v2392_v51  ;;  %v2878_v51 = vld [vmem:[%s3868_s3 + $0x20] sm:$0xff] }
 0x31b   :  { %754 = vmatpush.msrb.mxu3 %v733_v55  ;;  %998 = vmatpush.bf16.msrb.mxu2 %v2889_v43  ;;  %v2885_v55 = vld [vmem:[%s3868_s3 + $0x58] sm:$0xff]  ;;  %v2892_v43 = vld [vmem:[%s3868_s3 + $0x90] sm:$0xff] }
 0x31c   :  { %918 = vmatpush.bf16.msrb.mxu1 %v2878_v51 }
 0x31d   :  { %755 = vmatpush.msrb.mxu3 %v732_v56 }
 0x31f   :  { %756 = vmatpush.msrb.mxu3 %v731_v57  ;;  %999 = vmatpush.bf16.msrb.mxu2 %v2888_v46  ;;  %v2891_v46 = vld [vmem:[%s3868_s3 + $0x88] sm:$0xff] }
 0x320   :  { %v663_v54 = vpop.f32.mrf.mxu1 }
 0x321   :  { %757 = vmatpush.msrb.mxu3 %v730_v58  ;;  %v2877_v54 = vld [vmem:[%s3868_s3 + $0x18] sm:$0xff] }
 0x322   :  { %2395 = vmatmul.msk.f32.gmra.mxu3 %vm416_vm5, %v2393_v53  ;;  %919 = vmatpush.bf16.msrb.mxu1 %v2877_v54 }
 0x323   :  { %758 = vmatpush.msrb.mxu3 %v729_v59  ;;  %1000 = vmatpush.bf16.msrb.mxu2 %v2887_v50 }
 0x325   :  { %759 = vmatpush.msrb.mxu3 %v728_v60 }
 0x327   :  { %760 = vmatpush.msrb.mxu3 %v727_v61  ;;  %1001 = vmatpush.bf16.msrb.mxu2 %v2886_v52  ;;  %v699_v61 = vld [vmem:[%s3869_s13] sm:$0x1] }
 0x329   :  { %761 = vmatpush.msrb.mxu3 %v726_v62 }
 0x32b   :  { %762 = vmatpush.msrb.mxu3 %v725_v0  ;;  %1002 = vmatpush.bf16.msrb.mxu2 %v2885_v55  ;;  %v2396_v0 = vld [vmem:[%s3869_s13 + $0x1] sm:$0x1] }
 0x32d   :  { %763 = vmatpush.msrb.mxu3 %v724_v1 }
 0x32f   :  { %764 = vmatpush.msrb.mxu3 %v723_v2 }
 0x331   :  { %765 = vmatpush.msrb.mxu3 %v722_v3  ;;  %v2876_v3 = vld [vmem:[%s3868_s3 + $0x10] sm:$0xff] }
 0x332   :  { %920 = vmatpush.bf16.msrb.mxu1 %v2876_v3  ;;  %v2596_v3 = vld [vmem:[%s3870_s6 + $0x68] sm:$0xff] }
 0x333   :  { %766 = vmatpush.msrb.mxu3 %v721_v4  ;;  %v2884_v4 = vld [vmem:[%s3868_s3 + $0x50] sm:$0xff] }
 0x334   :  { %1003 = vmatpush.bf16.msrb.mxu2 %v2884_v4  ;;  %v2541_v4 = vld [vmem:[%s3870_s6 + $0x50] sm:$0xff] }
 0x335   :  { %767 = vmatpush.msrb.mxu3 %v720_v6  ;;  %v2883_v6 = vld [vmem:[%s3868_s3 + $0x48] sm:$0xff] }
 0x336   :  { %921 = vmatpush.bf16.msrb.mxu1 %v2875_v5  ;;  %v2597_v5 = vld [vmem:[%s3870_s6 + $0x70] sm:$0xff] }
 0x337   :  { %768 = vmatpush.msrb.mxu3 %v719_v7  ;;  %v2874_v7 = vld [vmem:[%s3868_s3] sm:$0xff] }
 0x338   :  { %1004 = vmatpush.bf16.msrb.mxu2 %v2883_v6  ;;  %v2542_v6 = vld [vmem:[%s3870_s6 + $0x58] sm:$0xff] }
 0x339   :  { %769 = vmatpush.msrb.mxu3 %v718_v8  ;;  %v2882_v8 = vld [vmem:[%s3868_s3 + $0x40] sm:$0xff] }
 0x33a   :  { %922 = vmatpush.bf16.msrb.mxu1 %v2874_v7  ;;  %v2598_v7 = vld [vmem:[%s3870_s6 + $0x78] sm:$0xff] }
 0x33c   :  { %1005 = vmatpush.bf16.msrb.mxu2 %v2882_v8  ;;  %v1397_v8 = vld [vmem:[%s3885_s19 + $0x78] sm:$0xff] }
 0x37d   :  { %v579_v9 = vpop.f32.mrf.mxu2 }
 0x37e   :  { %v585_v14 = vadd.f32 %v579_v9, %v470_v11 }
 0x385   :  { %v582_v12 = vpop.f32.mrf.mxu2 }
 0x386   :  { %v586_v15 = vadd.f32 %v582_v12, %v473_v13 }
 0x39d   :  { %v691_v10 = vpop.f32.mrf.mxu3 }
 0x39e   :  { %v3322_v16 = vadd.f32 %v691_v10, %v585_v14 }
 0x3a0   :  { %v709_v19 = vmul.f32 %v3322_v16, %v3322_v16 }
 0x3a5   :  { %v694_v17 = vpop.f32.mrf.mxu3 }
 0x3a6   :  { %v3324_v18 = vadd.f32 %v694_v17, %v586_v15 }
 0x3a8   :  { %v702_v20 = vadd.f32 %v3324_v18, %v3322_v16  ;;  %v710_v21 = vmul.f32 %v3324_v18, %v3324_v18 }
 0x3aa   :  { %v703_v23 = vrot.slane %v702_v20, 4  ;;  %v711_v24 = vadd.f32 %v710_v21, %v709_v19 }
 0x3ac   :  { %v704_v22 = vadd.f32 %v703_v23, %v702_v20  ;;  %v712_v25 = vrot.slane %v711_v24, 4 }
 0x3ae   :  { %v705_v26 = vrot.slane %v704_v22, 2  ;;  %v713_v27 = vadd.f32 %v712_v25, %v711_v24  ;;  %v929_v25 = vld [vmem:[%s3870_s6] sm:$0xff] }
 0x3b0   :  { %v706_v28 = vadd.f32 %v705_v26, %v704_v22  ;;  %v714_v29 = vrot.slane %v713_v27, 2 }
 0x3b2   :  { %v707_v30 = vrot.slane %v706_v28, 1  ;;  %v715_v31 = vadd.f32 %v714_v29, %v713_v27  ;;  %v2479_v27 = vld [vmem:[%s3870_s6 + $0x20] sm:$0xff]  ;;  %v930_v29 = vld [vmem:[%s3870_s6 + $0x8] sm:$0xff] }
 0x3b4   :  { %v708_v32 = vadd.f32 %v707_v30, %v706_v28  ;;  %v716_v33 = vrot.slane %v715_v31, 1  ;;  %v2897_v28 = vld [vmem:[%s3868_s3 + $0xb8] sm:$0xff]  ;;  %v2903_v30 = vld [vmem:[%s3868_s3 + $0xe8] sm:$0xff] }
 0x3b6   :  { %750 = vmatmul.f32.vlgmr.msra.gmra.mxu2 %v708_v32  ;;  %v717_v34 = vadd.f32 %v716_v33, %v715_v31  ;;  %v2896_v31 = vld [vmem:[%s3868_s3 + $0xb0] sm:$0xff]  ;;  %v2902_v32 = vld [vmem:[%s3868_s3 + $0xe0] sm:$0xff]  ;;  %v2480_v33 = vld [vmem:[%s3870_s6 + $0x28] sm:$0xff] }
 0x3b8   :  { %770 = vmatmul.f32.vlgmr.msrb.gmra.mxu3 %v717_v34  ;;  %v2895_v34 = vld [vmem:[%s3868_s3 + $0xa8] sm:$0xff] }
 0x439   :  { %v751_v37 = vpop.f32.mrf.mxu2 }
 0x43a   :  { %v774_v38 = vmul.f32 0.0078125, %v751_v37  ;;  %v2894_v37 = vld [vmem:[%s3868_s3 + $0xa0] sm:$0xff] }
 0x43b   :  { %v771_v39 = vpop.f32.mrf.mxu3 }
 0x43c   :  { %v776_v40 = vmul.f32 %v774_v38, %v774_v38  ;;  %v775_v41 = vmul.f32 0.0078125, %v771_v39  ;;  %v2481_v39 = vld [vmem:[%s3870_s6 + $0x30] sm:$0xff] }
 0x43e   :  { %v777_v44 = vsub.f32 %v775_v41, %v776_v40  ;;  %v2893_v40 = vld [vmem:[%s3868_s3 + $0x98] sm:$0xff] }
 0x43f   :  { %v932_v41 = vld [vmem:[%s3870_s6 + $0x18] sm:$0xff] }
 0x440   :  { %v778_v47 = vmax.f32 %v777_v44, 0.0  ;;  %v2898_v44 = vld [vmem:[%s3868_s3 + $0xc0] sm:$0xff] }
 0x442   :  { %v779_v48 = vadd.f32 1e-05, %v778_v47  ;;  %v2890_v47 = vld [vmem:[%s3868_s3 + $0x80] sm:$0xff] }
 0x444   :  { %2940 = vrsqrt.f32 %v779_v48  ;;  %vm786_vm7 = vweird.f32 %v779_v48 }
 0x44a   :  { %v2941_v53 = vpop.eup %2940 }
 0x44b   :  { %v781_v56 = vmul.f32 %v2941_v53, %v779_v48  ;;  %vm787_vm6 = vweird.f32 %v2941_v53 }
 0x44c   :  { %vm788_vm8 = vmor %vm786_vm7, %vm787_vm6 }
 0x44d   :  { %v782_v57 = vmul.f32 %v2941_v53, %v781_v56 }
 0x44f   :  { %v783_v58 = vmul.f32 0.5, %v782_v57 }
 0x451   :  { %v784_v59 = vsub.f32 1.5, %v783_v58 }
 0x453   :  { %v785_v60 = vmul.f32 %v2941_v53, %v784_v59 }
 0x455   :  { %v789_v62 = vsel %vm788_vm8, %v2941_v53, %v785_v60 }
 0x456   :  { %v790_v63 = vmul.f32 %v789_v62, %v699_v61 }
 0x458   :  { %2397 = vmatmul.msk.f32.vlgmr.msra.gmra.mxu1 %vm795_vm9, %v790_v63  ;;  %v791_v1 = vmul.f32 %v790_v63, %v774_v38  ;;  %v2900_v38 = vld [vmem:[%s3868_s3 + $0xd0] sm:$0xff] }
 0x45a   :  { %v792_v2 = vsub.f32 %v2396_v0, %v791_v1  ;;  %v2539_v0 = vld [vmem:[%s3870_s6 + $0x40] sm:$0xff] }
 0x45b   :  { %v2595_v1 = vld [vmem:[%s3870_s6 + $0x60] sm:$0xff] }
 0x45c   :  { %2398 = vmatmul.msk.f32.vlgmr.msra.gmra.mxu0 %vm795_vm9, %v792_v2  ;;  %v2540_v2 = vld [vmem:[%s3870_s6 + $0x48] sm:$0xff] }
 0x4d5   :  { %v816_v9 = vpop.f32.mrf.mxu1 }
 0x4d6   :  { %v842_v10 = vperm.slane %v816_v9, 0  ;;  %v1396_v9 = vld [vmem:[%s3885_s19 + $0x70] sm:$0xff] }
 0x4d8   :  { %v843_v12 = vmul.f32 %v842_v10, %v3322_v16  ;;  %v844_v13 = vmul.f32 %v842_v10, %v3324_v18  ;;  %v2905_v16 = vld [vmem:[%s3868_s3 + $0xf8] sm:$0xff]  ;;  %v2904_v18 = vld [vmem:[%s3868_s3 + $0xf0] sm:$0xff]  ;;  %v1395_v10 = vld [vmem:[%s3885_s19 + $0x68] sm:$0xff] }
 0x4d9   :  { %v839_v11 = vpop.f32.mrf.mxu0 }
 0x4da   :  { %v845_v14 = vperm.slane %v839_v11, 0  ;;  %v1394_v11 = vld [vmem:[%s3885_s19 + $0x60] sm:$0xff] }
 0x4dc   :  { %v846_v15 = vadd.f32 %v845_v14, %v843_v12  ;;  %v847_v17 = vadd.f32 %v845_v14, %v844_v13  ;;  %v1393_v12 = vld [vmem:[%s3885_s19 + $0x58] sm:$0xff]  ;;  %v1392_v13 = vld [vmem:[%s3885_s19 + $0x50] sm:$0xff]  ;;  %v1391_v14 = vld [vmem:[%s3885_s19 + $0x48] sm:$0xff] }
 0x4de   :  { %v848_v19 = vmax.f32 %v846_v15, 0.0  ;;  %v849_v20 = vmax.f32 %v847_v17, 0.0  ;;  %v1390_v15 = vld [vmem:[%s3885_s19 + $0x40] sm:$0xff]  ;;  %v1389_v17 = vld [vmem:[%s3885_s19 + $0x38] sm:$0xff] }
 0x4e0   :  { %v850_v21 = vpack.c.bf16 %v849_v20, %v848_v19  ;;  %v1388_v20 = vld [vmem:[%s3885_s19 + $0x30] sm:$0xff] }
 0x4e2   :  { %923 = vmatmul.bf16.vlgmr.msrb.gmra.mxu1 %v850_v21  ;;  %1006 = vmatmul.bf16.vlgmr.msrb.gmra.mxu2 %v850_v21 }
 0x55f   :  { %v924_v23 = vpop.f32.mrf.mxu1 }
 0x565   :  { %v1007_v24 = vpop.f32.mrf.mxu2 }
 0x567   :  { %v926_v22 = vpop.f32.mrf.mxu1 }
 0x568   :  { %1084 = vmatpush.msra.mxu3 %v926_v22  ;;  %v1385_v22 = vld [vmem:[%s3885_s19 + $0x18] sm:$0xff] }
 0x56a   :  { %1085 = vmatpush.msra.mxu3 %v924_v23  ;;  %v1386_v23 = vld [vmem:[%s3885_s19 + $0x20] sm:$0xff] }
 0x56b   :  { %2487 = vmatmul.msk.f32.vlgmr.msra.gmra.mxu3 %vm795_vm9, %v929_v25 }
 0x56c   :  { %1293 = vmatpush.bf16.msrb.mxu3 %v2905_v16  ;;  %v1384_v16 = vld [vmem:[%s3885_s19 + $0x10] sm:$0xff] }
 0x56d   :  { %v1009_v26 = vpop.f32.mrf.mxu2 }
 0x56e   :  { %1043 = vmatpush.msrb.mxu0 %v1009_v26  ;;  %v1382_v26 = vld [vmem:[%s3885_s19] sm:$0xff] }
 0x570   :  { %1044 = vmatpush.msrb.mxu0 %v1007_v24  ;;  %1294 = vmatpush.bf16.msrb.mxu3 %v2904_v18  ;;  %v1383_v18 = vld [vmem:[%s3885_s19 + $0x8] sm:$0xff] }
 0x571   :  { %2483 = vmatmul.msk.f32.vlgmr.msrb.gmra.mxu0 %vm795_vm9, %v2479_v27 }
 0x572   :  { %1164 = vmatpush.bf16.msra.mxu0 %v2897_v28 }
 0x573   :  { %2488 = vmatmul.msk.f32.gmra.mxu3 %vm795_vm9, %v930_v29 }
 0x574   :  { %1295 = vmatpush.bf16.msrb.mxu3 %v2903_v30 }
 0x576   :  { %1165 = vmatpush.bf16.msra.mxu0 %v2896_v31 }
 0x578   :  { %1296 = vmatpush.bf16.msrb.mxu3 %v2902_v32 }
 0x579   :  { %2484 = vmatmul.msk.f32.gmra.mxu0 %vm795_vm9, %v2480_v33 }
 0x57a   :  { %1166 = vmatpush.bf16.msra.mxu0 %v2895_v34 }
 0x57b   :  { %2489 = vmatmul.msk.f32.gmra.mxu3 %vm795_vm9, %v931_v35 }
 0x57c   :  { %1297 = vmatpush.bf16.msrb.mxu3 %v2901_v36 }
 0x57e   :  { %1167 = vmatpush.bf16.msra.mxu0 %v2894_v37 }
 0x580   :  { %1298 = vmatpush.bf16.msrb.mxu3 %v2900_v38 }
 0x581   :  { %2485 = vmatmul.msk.f32.gmra.mxu0 %vm795_vm9, %v2481_v39 }
 0x582   :  { %1168 = vmatpush.bf16.msra.mxu0 %v2893_v40 }
 0x583   :  { %2490 = vmatmul.msk.f32.gmra.mxu3 %vm795_vm9, %v932_v41 }
 0x584   :  { %1299 = vmatpush.bf16.msrb.mxu3 %v2899_v42 }
 0x586   :  { %1169 = vmatpush.bf16.msra.mxu0 %v2892_v43 }
 0x588   :  { %1300 = vmatpush.bf16.msrb.mxu3 %v2898_v44 }
 0x589   :  { %2486 = vmatmul.msk.f32.gmra.mxu0 %vm795_vm9, %v2482_v45 }
 0x58a   :  { %1170 = vmatpush.bf16.msra.mxu0 %v2891_v46 }
 0x58b   :  { %1301 = vmatmul.bf16.vlgmr.msrb.gmra.mxu3 %v850_v21 }
 0x58e   :  { %1171 = vmatpush.bf16.msra.mxu0 %v2890_v47 }
 0x591   :  { %1172 = vmatmul.bf16.vlgmr.msra.gmra.mxu0 %v850_v21  ;;  %v1387_v21 = vld [vmem:[%s3885_s19 + $0x28] sm:$0xff] }
 0x592   :  { %1398 = vmatpush.msrb.mxu0 %v1397_v8 }
 0x594   :  { %1399 = vmatpush.msrb.mxu0 %v1396_v9 }
 0x596   :  { %1400 = vmatpush.msrb.mxu0 %v1395_v10 }
 0x598   :  { %1401 = vmatpush.msrb.mxu0 %v1394_v11 }
 0x59a   :  { %1402 = vmatpush.msrb.mxu0 %v1393_v12 }
 0x59c   :  { %1403 = vmatpush.msrb.mxu0 %v1392_v13 }
 0x59e   :  { %1404 = vmatpush.msrb.mxu0 %v1391_v14 }
 0x5a0   :  { %1405 = vmatpush.msrb.mxu0 %v1390_v15 }
 0x5a2   :  { %1406 = vmatpush.msrb.mxu0 %v1389_v17 }
 0x5a4   :  { %1407 = vmatpush.msrb.mxu0 %v1388_v20 }
 0x5a6   :  { %1408 = vmatpush.msrb.mxu0 %v1387_v21 }
 0x5a8   :  { %1409 = vmatpush.msrb.mxu0 %v1386_v23 }
 0x5aa   :  { %1410 = vmatpush.msrb.mxu0 %v1385_v22 }
 0x5ac   :  { %1411 = vmatpush.msrb.mxu0 %v1384_v16 }
 0x5ae   :  { %1412 = vmatpush.msrb.mxu0 %v1383_v18 }
 0x5b0   :  { %1413 = vmatpush.msrb.mxu0 %v1382_v26 }
 0x5ee   :  { %v1046_v48 = vpop.f32.mrf.mxu0  ;;  %v1087_v49 = vpop.f32.mrf.mxu3 }
 0x5ef   :  { %v3476_v50 = vadd.f32 %v1087_v49, %v1046_v48 }
 0x5f6   :  { %v1049_v51 = vpop.f32.mrf.mxu0  ;;  %v1090_v52 = vpop.f32.mrf.mxu3 }
 0x5f7   :  { %v3478_v53 = vadd.f32 %v1090_v52, %v1049_v51 }
 0x5fe   :  { %v1052_v54 = vpop.f32.mrf.mxu0  ;;  %v1093_v55 = vpop.f32.mrf.mxu3 }
 0x5ff   :  { %v3480_v56 = vadd.f32 %v1093_v55, %v1052_v54 }
 0x606   :  { %v1055_v57 = vpop.f32.mrf.mxu0  ;;  %v1096_v58 = vpop.f32.mrf.mxu3 }
 0x607   :  { %v3482_v59 = vadd.f32 %v1096_v58, %v1055_v57 }
 0x60e   :  { %v1173_v60 = vpop.f32.mrf.mxu0  ;;  %v1302_v61 = vpop.f32.mrf.mxu3 }
 0x616   :  { %v1175_v62 = vpop.f32.mrf.mxu0  ;;  %v1304_v63 = vpop.f32.mrf.mxu3 }
 0x617   :  { %1209 = vmatpush.msra.mxu1 %v1175_v62  ;;  %1338 = vmatpush.msra.mxu2 %v1304_v63  ;;  %v1457_v62 = vld [vmem:[%s3872_s15] sm:$0xff] }
 0x618   :  { %1476 = vmatpush.msra.mxu3 %v1457_v62 }
 0x619   :  { %1210 = vmatpush.msra.mxu1 %v1173_v60  ;;  %1339 = vmatpush.msra.mxu2 %v1302_v61 }
 0x61a   :  { %2543 = vmatmul.msk.f32.vlgmr.msra.gmra.mxu1 %vm795_vm9, %v2539_v0  ;;  %2599 = vmatmul.msk.f32.vlgmr.msra.gmra.mxu2 %vm795_vm9, %v2595_v1 }
 0x61b   :  { %1418 = vmatpush.msrb.mxu1 %v1397_v8  ;;  %1499 = vmatpush.msrb.mxu3 %v1457_v62  ;;  %v2912_v8 = vld [vmem:[%s3873_s4 + $0x30] sm:$0xff] }
 0x61d   :  { %1419 = vmatpush.msrb.mxu1 %v1396_v9  ;;  %v2911_v9 = vld [vmem:[%s3873_s4 + $0x28] sm:$0xff] }
 0x61f   :  { %1420 = vmatpush.msrb.mxu1 %v1395_v10 }
 0x621   :  { %1421 = vmatpush.msrb.mxu1 %v1394_v11  ;;  %v2910_v11 = vld [vmem:[%s3873_s4 + $0x20] sm:$0xff] }
 0x622   :  { %2544 = vmatmul.msk.f32.gmra.mxu1 %vm795_vm9, %v2540_v2  ;;  %2600 = vmatmul.msk.f32.gmra.mxu2 %vm795_vm9, %v2596_v3 }
 0x623   :  { %1422 = vmatpush.msrb.mxu1 %v1393_v12 }
 0x625   :  { %1423 = vmatpush.msrb.mxu1 %v1392_v13 }
 0x627   :  { %1424 = vmatpush.msrb.mxu1 %v1391_v14 }
 0x629   :  { %1425 = vmatpush.msrb.mxu1 %v1390_v15 }
 0x62a   :  { %2545 = vmatmul.msk.f32.gmra.mxu1 %vm795_vm9, %v2541_v4  ;;  %2601 = vmatmul.msk.f32.gmra.mxu2 %vm795_vm9, %v2597_v5 }
 0x62b   :  { %1426 = vmatpush.msrb.mxu1 %v1389_v17 }
 0x62d   :  { %1427 = vmatpush.msrb.mxu1 %v1388_v20 }
 0x62f   :  { %1428 = vmatpush.msrb.mxu1 %v1387_v21  ;;  %v2921_v21 = vld [vmem:[%s3873_s4 + $0x78] sm:$0xff] }
 0x631   :  { %1429 = vmatpush.msrb.mxu1 %v1386_v23 }
 0x632   :  { %2546 = vmatmul.msk.f32.gmra.mxu1 %vm795_vm9, %v2542_v6  ;;  %2602 = vmatmul.msk.f32.gmra.mxu2 %vm795_vm9, %v2598_v7  ;;  %v2913_v6 = vld [vmem:[%s3873_s4 + $0x38] sm:$0xff] }
 0x633   :  { %1430 = vmatpush.msrb.mxu1 %v1385_v22  ;;  %1584 = vmatpush.bf16.msrb.mxu2 %v2913_v6 }
 0x635   :  { %1431 = vmatpush.msrb.mxu1 %v1384_v16  ;;  %v2919_v16 = vld [vmem:[%s3873_s4 + $0x68] sm:$0xff] }
 0x637   :  { %1432 = vmatpush.msrb.mxu1 %v1383_v18  ;;  %1585 = vmatpush.bf16.msrb.mxu2 %v2912_v8 }
 0x639   :  { %1433 = vmatpush.msrb.mxu1 %v1382_v26  ;;  %v2918_v26 = vld [vmem:[%s3873_s4 + $0x60] sm:$0xff] }
 0x63b   :  { %1586 = vmatpush.bf16.msrb.mxu2 %v2911_v9 }
 0x63f   :  { %1587 = vmatpush.bf16.msrb.mxu2 %v2910_v11 }
 0x697   :  { %v1212_v19 = vpop.f32.mrf.mxu1 }
 0x698   :  { %v1224_v31 = vadd.f32 %v1212_v19, %v3476_v50  ;;  %v1357_v19 = vld [vmem:[%s3874_s16] sm:$0x1] }
 0x69d   :  { %v1341_v24 = vpop.f32.mrf.mxu2 }
 0x69e   :  { %v3569_v34 = vadd.f32 %v1341_v24, %v1224_v31  ;;  %v2920_v24 = vld [vmem:[%s3873_s4 + $0x70] sm:$0xff]  ;;  %v2907_v31 = vld [vmem:[%s3873_s4 + $0x8] sm:$0xff] }
 0x69f   :  { %v1215_v25 = vpop.f32.mrf.mxu1 }
 0x6a0   :  { %v1225_v29 = vadd.f32 %v1215_v25, %v3478_v53  ;;  %v1369_v38 = vmul.f32 %v3569_v34, %v3569_v34  ;;  %v2603_v25 = vld [vmem:[%s3874_s16 + $0x1] sm:$0x1] }
 0x6a5   :  { %v1344_v27 = vpop.f32.mrf.mxu2 }
 0x6a6   :  { %v3566_v32 = vadd.f32 %v1344_v27, %v1225_v29  ;;  %v2909_v27 = vld [vmem:[%s3873_s4 + $0x18] sm:$0xff]  ;;  %v2908_v29 = vld [vmem:[%s3873_s4 + $0x10] sm:$0xff] }
 0x6a7   :  { %v1218_v28 = vpop.f32.mrf.mxu1  ;;  %1588 = vmatpush.bf16.msrb.mxu2 %v2909_v27  ;;  %v1607_v27 = vld [vmem:[%s3875_s7 + $0x20] sm:$0xff] }
 0x6a8   :  { %v1226_v33 = vadd.f32 %v1218_v28, %v3480_v56  ;;  %v1370_v37 = vmul.f32 %v3566_v32, %v3566_v32  ;;  %v1360_v39 = vadd.f32 %v3566_v32, %v3569_v34  ;;  %v2917_v28 = vld [vmem:[%s3873_s4 + $0x58] sm:$0xff] }
 0x6aa   :  { %v1373_v43 = vadd.f32 %v1370_v37, %v1369_v38  ;;  %v2914_v37 = vld [vmem:[%s3873_s4 + $0x40] sm:$0xff]  ;;  %v2929_v38 = vld [vmem:[%s3873_s4 + $0xb8] sm:$0xff] }
 0x6ab   :  { %1589 = vmatpush.bf16.msrb.mxu2 %v2908_v29  ;;  %v2691_v29 = vld [vmem:[%s3875_s7 + $0x68] sm:$0xff] }
 0x6ad   :  { %v1347_v30 = vpop.f32.mrf.mxu2 }
 0x6ae   :  { %v3571_v35 = vadd.f32 %v1347_v30, %v1226_v33  ;;  %v2916_v30 = vld [vmem:[%s3873_s4 + $0x50] sm:$0xff]  ;;  %v2915_v33 = vld [vmem:[%s3873_s4 + $0x48] sm:$0xff] }
 0x6af   :  { %v1221_v36 = vpop.f32.mrf.mxu1  ;;  %1590 = vmatpush.bf16.msrb.mxu2 %v2907_v31  ;;  %v1608_v31 = vld [vmem:[%s3875_s7 + $0x28] sm:$0xff] }
 0x6b0   :  { %v1371_v40 = vmul.f32 %v3571_v35, %v3571_v35  ;;  %v1227_v41 = vadd.f32 %v1221_v36, %v3482_v59  ;;  %v1361_v44 = vadd.f32 %v1360_v39, %v3571_v35  ;;  %v2906_v36 = vld [vmem:[%s3873_s4] sm:$0xff]  ;;  %v2928_v39 = vld [vmem:[%s3873_s4 + $0xb0] sm:$0xff] }
 0x6b2   :  { %v1374_v46 = vadd.f32 %v1373_v43, %v1371_v40  ;;  %v2927_v40 = vld [vmem:[%s3873_s4 + $0xa8] sm:$0xff]  ;;  %v2925_v43 = vld [vmem:[%s3873_s4 + $0x98] sm:$0xff] }
 0x6b3   :  { %1591 = vmatpush.bf16.msrb.mxu2 %v2906_v36  ;;  %v2692_v36 = vld [vmem:[%s3875_s7 + $0x70] sm:$0xff] }
 0x6b5   :  { %v1350_v42 = vpop.f32.mrf.mxu2 }
 0x6b6   :  { %v3583_v45 = vadd.f32 %v1350_v42, %v1227_v41  ;;  %v2926_v41 = vld [vmem:[%s3873_s4 + $0xa0] sm:$0xff] }
 0x6b7   :  { %1899 = vmatpush.bf16.msra.mxu2 %v2929_v38  ;;  %v1609_v38 = vld [vmem:[%s3875_s7 + $0x30] sm:$0xff] }
 0x6b8   :  { %v1362_v47 = vadd.f32 %v1361_v44, %v3583_v45  ;;  %v1372_v48 = vmul.f32 %v3583_v45, %v3583_v45  ;;  %v2924_v44 = vld [vmem:[%s3873_s4 + $0x90] sm:$0xff] }
 0x6ba   :  { %v1363_v49 = vrot.slane %v1362_v47, 4  ;;  %v1375_v50 = vadd.f32 %v1374_v46, %v1372_v48 }
 0x6bb   :  { %1900 = vmatpush.bf16.msra.mxu2 %v2928_v39 }
 0x6bc   :  { %v1364_v51 = vadd.f32 %v1363_v49, %v1362_v47  ;;  %v1376_v52 = vrot.slane %v1375_v50, 4  ;;  %v2923_v47 = vld [vmem:[%s3873_s4 + $0x88] sm:$0xff] }
 0x6be   :  { %v1365_v53 = vrot.slane %v1364_v51, 2  ;;  %v1377_v54 = vadd.f32 %v1376_v52, %v1375_v50  ;;  %v2922_v52 = vld [vmem:[%s3873_s4 + $0x80] sm:$0xff] }
 0x6bf   :  { %1901 = vmatpush.bf16.msra.mxu2 %v2927_v40  ;;  %v2693_v40 = vld [vmem:[%s3875_s7 + $0x78] sm:$0xff] }
 0x6c0   :  { %v1366_v55 = vadd.f32 %v1365_v53, %v1364_v51  ;;  %v1378_v56 = vrot.slane %v1377_v54, 2 }
 0x6c2   :  { %v1367_v57 = vrot.slane %v1366_v55, 1  ;;  %v1379_v58 = vadd.f32 %v1378_v56, %v1377_v54 }
 0x6c3   :  { %1902 = vmatpush.bf16.msra.mxu2 %v2926_v41  ;;  %v2761_v41 = vld [vmem:[%s3875_s7 + $0x98] sm:$0xff] }
 0x6c4   :  { %v1368_v59 = vadd.f32 %v1367_v57, %v1366_v55  ;;  %v1380_v60 = vrot.slane %v1379_v58, 1 }
 0x6c6   :  { %1414 = vmatmul.f32.vlgmr.msrb.gmra.mxu0 %v1368_v59  ;;  %v1381_v61 = vadd.f32 %v1380_v60, %v1379_v58  ;;  %v2937_v58 = vld [vmem:[%s3873_s4 + $0xf8] sm:$0xff]  ;;  %v2935_v60 = vld [vmem:[%s3873_s4 + $0xe8] sm:$0xff] }
 0x6c7   :  { %1903 = vmatpush.bf16.msra.mxu2 %v2925_v43 }
 0x6c8   :  { %1434 = vmatmul.f32.vlgmr.msrb.gmra.mxu1 %v1381_v61 }
 0x6cb   :  { %1904 = vmatpush.bf16.msra.mxu2 %v2924_v44  ;;  %v2822_v44 = vld [vmem:[%s3875_s7 + $0xc0] sm:$0xff] }
 0x6cf   :  { %1905 = vmatpush.bf16.msra.mxu2 %v2923_v47  ;;  %v2823_v47 = vld [vmem:[%s3875_s7 + $0xc8] sm:$0xff] }
 0x6d3   :  { %1906 = vmatpush.bf16.msra.mxu2 %v2922_v52  ;;  %v2765_v52 = vld [vmem:[%s3875_s7 + $0xb8] sm:$0xff] }
 0x743   :  { %v1415_v63 = vpop.f32.mrf.mxu0 }
 0x744   :  { %v1438_v0 = vmul.f32 0.001953125, %v1415_v63  ;;  %v2934_v63 = vld [vmem:[%s3873_s4 + $0xe0] sm:$0xff] }
 0x745   :  { %v1435_v1 = vpop.f32.mrf.mxu1 }
 0x746   :  { %v1440_v2 = vmul.f32 %v1438_v0, %v1438_v0  ;;  %v1439_v3 = vmul.f32 0.001953125, %v1435_v1 }
 0x748   :  { %v1441_v4 = vsub.f32 %v1439_v3, %v1440_v2  ;;  %v2931_v3 = vld [vmem:[%s3873_s4 + $0xc8] sm:$0xff] }
 0x74a   :  { %v1442_v5 = vmax.f32 %v1441_v4, 0.0  ;;  %v2930_v4 = vld [vmem:[%s3873_s4 + $0xc0] sm:$0xff] }
 0x74c   :  { %v1443_v7 = vadd.f32 1e-05, %v1442_v5 }
 0x74e   :  { %2942 = vrsqrt.f32 %v1443_v7  ;;  %vm1450_vm11 = vweird.f32 %v1443_v7 }
 0x754   :  { %v2943_v10 = vpop.eup %2942 }
 0x755   :  { %v1445_v12 = vmul.f32 %v2943_v10, %v1443_v7  ;;  %vm1451_vm10 = vweird.f32 %v2943_v10 }
 0x756   :  { %vm1452_vm12 = vmor %vm1450_vm11, %vm1451_vm10 }
 0x757   :  { %v1446_v13 = vmul.f32 %v2943_v10, %v1445_v12 }
 0x759   :  { %v1447_v14 = vmul.f32 0.5, %v1446_v13  ;;  %v2686_v13 = vld [vmem:[%s3875_s7 + $0x40] sm:$0xff] }
 0x75b   :  { %v1448_v15 = vsub.f32 1.5, %v1447_v14  ;;  %v1603_v14 = vld [vmem:[%s3875_s7] sm:$0xff] }
 0x75d   :  { %v1449_v17 = vmul.f32 %v2943_v10, %v1448_v15 }
 0x75f   :  { %v1453_v20 = vsel %vm1452_vm12, %v2943_v10, %v1449_v17  ;;  %v2687_v17 = vld [vmem:[%s3875_s7 + $0x48] sm:$0xff] }
 0x760   :  { %v1454_v23 = vmul.f32 %v1453_v20, %v1357_v19  ;;  %v1604_v19 = vld [vmem:[%s3875_s7 + $0x8] sm:$0xff] }
 0x762   :  { %2604 = vmatmul.msk.f32.vlgmr.msra.gmra.mxu3 %vm416_vm5, %v1454_v23  ;;  %v1455_v22 = vmul.f32 %v1454_v23, %v1438_v0  ;;  %v1605_v23 = vld [vmem:[%s3875_s7 + $0x10] sm:$0xff] }
 0x763   :  { %1676 = vmatpush.bf16.msra.mxu3 %v2921_v21  ;;  %v2688_v21 = vld [vmem:[%s3875_s7 + $0x50] sm:$0xff] }
 0x764   :  { %v1456_v18 = vsub.f32 %v2603_v25, %v1455_v22  ;;  %v2689_v22 = vld [vmem:[%s3875_s7 + $0x58] sm:$0xff] }
 0x765   :  { %v1606_v25 = vld [vmem:[%s3875_s7 + $0x18] sm:$0xff] }
 0x767   :  { %1677 = vmatpush.bf16.msra.mxu3 %v2920_v24 }
 0x76a   :  { %2605 = vmatmul.msk.f32.vlgmr.msrb.gmra.mxu3 %vm416_vm5, %v1456_v18  ;;  %v2690_v18 = vld [vmem:[%s3875_s7 + $0x60] sm:$0xff] }
 0x76b   :  { %1678 = vmatpush.bf16.msra.mxu3 %v2919_v16 }
 0x76f   :  { %1679 = vmatpush.bf16.msra.mxu3 %v2918_v26  ;;  %v2758_v26 = vld [vmem:[%s3875_s7 + $0x80] sm:$0xff] }
 0x773   :  { %1680 = vmatpush.bf16.msra.mxu3 %v2917_v28 }
 0x777   :  { %1681 = vmatpush.bf16.msra.mxu3 %v2916_v30  ;;  %v2759_v30 = vld [vmem:[%s3875_s7 + $0x88] sm:$0xff] }
 0x77b   :  { %1682 = vmatpush.bf16.msra.mxu3 %v2915_v33 }
 0x77f   :  { %1683 = vmatpush.bf16.msra.mxu3 %v2914_v37  ;;  %v2760_v37 = vld [vmem:[%s3875_s7 + $0x90] sm:$0xff] }
 0x7e5   :  { %v1478_v42 = vpop.f32.mrf.mxu3 }
 0x7e6   :  { %v1504_v46 = vperm.slane %v1478_v42, 0  ;;  %v1610_v42 = vld [vmem:[%s3875_s7 + $0x38] sm:$0xff] }
 0x7e8   :  { %v1505_v49 = vmul.f32 %v1504_v46, %v3569_v34  ;;  %v1506_v50 = vmul.f32 %v1504_v46, %v3566_v32  ;;  %v2936_v32 = vld [vmem:[%s3873_s4 + $0xf0] sm:$0xff]  ;;  %v1507_v34 = vmul.f32 %v1504_v46, %v3571_v35  ;;  %v1508_v59 = vmul.f32 %v1504_v46, %v3583_v45  ;;  %v2933_v35 = vld [vmem:[%s3873_s4 + $0xd8] sm:$0xff]  ;;  %v2762_v46 = vld [vmem:[%s3875_s7 + $0xa0] sm:$0xff] }
 0x7e9   :  { %v2932_v45 = vld [vmem:[%s3873_s4 + $0xd0] sm:$0xff] }
 0x7ed   :  { %v1501_v48 = vpop.f32.mrf.mxu3 }
 0x7ee   :  { %v1509_v51 = vperm.slane %v1501_v48, 0  ;;  %v2763_v48 = vld [vmem:[%s3875_s7 + $0xa8] sm:$0xff] }
 0x7f0   :  { %v1510_v53 = vadd.f32 %v1509_v51, %v1505_v49  ;;  %v1511_v54 = vadd.f32 %v1509_v51, %v1506_v50  ;;  %v1512_v61 = vadd.f32 %v1509_v51, %v1507_v34  ;;  %v1513_v62 = vadd.f32 %v1509_v51, %v1508_v59  ;;  %v2824_v49 = vld [vmem:[%s3875_s7 + $0xd0] sm:$0xff]  ;;  %v2825_v51 = vld [vmem:[%s3875_s7 + $0xd8] sm:$0xff] }
 0x7f1   :  { %v2764_v50 = vld [vmem:[%s3875_s7 + $0xb0] sm:$0xff] }
 0x7f2   :  { %v1514_v55 = vmax.f32 %v1510_v53, 0.0  ;;  %v1515_v56 = vmax.f32 %v1511_v54, 0.0  ;;  %v1516_v0 = vmax.f32 %v1512_v61, 0.0  ;;  %v1517_v1 = vmax.f32 %v1513_v62, 0.0  ;;  %v2826_v53 = vld [vmem:[%s3875_s7 + $0xe0] sm:$0xff]  ;;  %v2827_v54 = vld [vmem:[%s3875_s7 + $0xe8] sm:$0xff] }
 0x7f4   :  { %v1518_v57 = vpack.c.bf16 %v1515_v56, %v1514_v55  ;;  %v1519_v2 = vpack.c.bf16 %v1517_v1, %v1516_v0  ;;  %v2828_v55 = vld [vmem:[%s3875_s7 + $0xf0] sm:$0xff]  ;;  %v2829_v56 = vld [vmem:[%s3875_s7 + $0xf8] sm:$0xff] }
 0x7f6   :  { %1592 = vmatmul.bf16.vlgmr.msrb.gmra.mxu2 %v1518_v57  ;;  %1684 = vmatmul.bf16.vlgmr.msra.gmra.mxu3 %v1518_v57 }
 0x7f7   :  { %2065 = vmatpush.bf16.msrb.mxu2 %v2937_v58 }
 0x7fb   :  { %2066 = vmatpush.bf16.msrb.mxu2 %v2936_v32 }
 0x7ff   :  { %2067 = vmatpush.bf16.msrb.mxu2 %v2935_v60 }
 0x803   :  { %2068 = vmatpush.bf16.msrb.mxu2 %v2934_v63 }
 0x806   :  { %1597 = vmatmul.bf16.gmra.mxu2 %v1519_v2  ;;  %1689 = vmatmul.bf16.gmra.mxu3 %v1519_v2 }
 0x807   :  { %2069 = vmatpush.bf16.msrb.mxu2 %v2933_v35 }
 0x80b   :  { %2070 = vmatpush.bf16.msrb.mxu2 %v2932_v45 }
 0x80f   :  { %2071 = vmatpush.bf16.msrb.mxu2 %v2931_v3 }
 0x813   :  { %2072 = vmatpush.bf16.msrb.mxu2 %v2930_v4 }
 0x816   :  { %1907 = vmatmul.bf16.vlgmr.msra.gmra.mxu2 %v1518_v57 }
 0x826   :  { %1912 = vmatmul.bf16.gmra.mxu2 %v1519_v2 }
 0x836   :  { %2073 = vmatmul.bf16.vlgmr.msrb.gmra.mxu2 %v1518_v57 }
 0x846   :  { %2078 = vmatmul.bf16.gmra.mxu2 %v1519_v2 }
 0x879   :  { %v1593_v5 = vpop.f32.mrf.mxu2  ;;  %v1685_v6 = vpop.f32.mrf.mxu3 }
 0x881   :  { %v1595_v7 = vpop.f32.mrf.mxu2  ;;  %v1687_v8 = vpop.f32.mrf.mxu3 }
 0x889   :  { %v1598_v9 = vpop.f32.mrf.mxu2  ;;  %v1690_v10 = vpop.f32.mrf.mxu3 }
 0x891   :  { %v1600_v11 = vpop.f32.mrf.mxu2  ;;  %v1692_v12 = vpop.f32.mrf.mxu3 }
 0x892   :  { %1740 = vmatpush.msra.mxu0 %v1692_v12  ;;  %1805 = vmatpush.msra.mxu1 %v1600_v11 }
 0x894   :  { %1741 = vmatpush.msra.mxu0 %v1690_v10  ;;  %1806 = vmatpush.msra.mxu1 %v1598_v9 }
 0x896   :  { %1742 = vmatpush.msra.mxu0 %v1687_v8  ;;  %1807 = vmatpush.msra.mxu1 %v1595_v7 }
 0x898   :  { %1743 = vmatpush.msra.mxu0 %v1685_v6  ;;  %1808 = vmatpush.msra.mxu1 %v1593_v5 }
 0x899   :  { %2694 = vmatmul.msk.f32.vlgmr.msra.gmra.mxu0 %vm203_vm4, %v2686_v13  ;;  %v1908_v15 = vpop.f32.mrf.mxu2  ;;  %2702 = vmatmul.msk.f32.vlgmr.msra.gmra.mxu1 %vm203_vm4, %v1603_v14 }
 0x8a1   :  { %2695 = vmatmul.msk.f32.gmra.mxu0 %vm203_vm4, %v2687_v17  ;;  %v1910_v20 = vpop.f32.mrf.mxu2  ;;  %2703 = vmatmul.msk.f32.gmra.mxu1 %vm203_vm4, %v1604_v19 }
 0x8a9   :  { %2696 = vmatmul.msk.f32.gmra.mxu0 %vm203_vm4, %v2688_v21  ;;  %v1913_v24 = vpop.f32.mrf.mxu2  ;;  %2704 = vmatmul.msk.f32.gmra.mxu1 %vm203_vm4, %v1605_v23 }
 0x8b1   :  { %2697 = vmatmul.msk.f32.gmra.mxu0 %vm203_vm4, %v2689_v22  ;;  %v1915_v16 = vpop.f32.mrf.mxu2  ;;  %2705 = vmatmul.msk.f32.gmra.mxu1 %vm203_vm4, %v1606_v25 }
 0x8b2   :  { %1963 = vmatpush.msrb.mxu3 %v1915_v16 }
 0x8b4   :  { %1964 = vmatpush.msrb.mxu3 %v1913_v24 }
 0x8b6   :  { %1965 = vmatpush.msrb.mxu3 %v1910_v20 }
 0x8b8   :  { %1966 = vmatpush.msrb.mxu3 %v1908_v15 }
 0x8b9   :  { %2698 = vmatmul.msk.f32.gmra.mxu0 %vm203_vm4, %v2690_v18  ;;  %v2074_v28 = vpop.f32.mrf.mxu2  ;;  %2766 = vmatmul.msk.f32.vlgmr.msrb.gmra.mxu3 %vm203_vm4, %v2758_v26 }
 0x8ba   :  { %2706 = vmatmul.msk.f32.gmra.mxu1 %vm203_vm4, %v1607_v27 }
 0x8c1   :  { %2699 = vmatmul.msk.f32.gmra.mxu0 %vm203_vm4, %v2691_v29  ;;  %v2076_v33 = vpop.f32.mrf.mxu2  ;;  %2767 = vmatmul.msk.f32.gmra.mxu3 %vm203_vm4, %v2759_v30 }
 0x8c2   :  { %2707 = vmatmul.msk.f32.gmra.mxu1 %vm203_vm4, %v1608_v31 }
 0x8c9   :  { %2700 = vmatmul.msk.f32.gmra.mxu0 %vm203_vm4, %v2692_v36  ;;  %v2079_v39 = vpop.f32.mrf.mxu2  ;;  %2768 = vmatmul.msk.f32.gmra.mxu3 %vm203_vm4, %v2760_v37 }
 0x8ca   :  { %2708 = vmatmul.msk.f32.gmra.mxu1 %vm203_vm4, %v1609_v38 }
 0x8d1   :  { %2701 = vmatmul.msk.f32.gmra.mxu0 %vm203_vm4, %v2693_v40  ;;  %v2081_v43 = vpop.f32.mrf.mxu2  ;;  %2769 = vmatmul.msk.f32.gmra.mxu3 %vm203_vm4, %v2761_v41 }
 0x8d2   :  { %2129 = vmatpush.msrb.mxu0 %v2081_v43  ;;  %2709 = vmatmul.msk.f32.gmra.mxu1 %vm203_vm4, %v1610_v42 }
 0x8d4   :  { %2130 = vmatpush.msrb.mxu0 %v2079_v39 }
 0x8d6   :  { %2131 = vmatpush.msrb.mxu0 %v2076_v33 }
 0x8d8   :  { %2132 = vmatpush.msrb.mxu0 %v2074_v28 }
 0x8d9   :  { %2830 = vmatmul.msk.f32.vlgmr.msrb.gmra.mxu0 %vm203_vm4, %v2822_v44  ;;  %2770 = vmatmul.msk.f32.gmra.mxu3 %vm203_vm4, %v2762_v46 }
 0x8e1   :  { %2831 = vmatmul.msk.f32.gmra.mxu0 %vm203_vm4, %v2823_v47  ;;  %2771 = vmatmul.msk.f32.gmra.mxu3 %vm203_vm4, %v2763_v48 }
 0x8e9   :  { %2832 = vmatmul.msk.f32.gmra.mxu0 %vm203_vm4, %v2824_v49  ;;  %2772 = vmatmul.msk.f32.gmra.mxu3 %vm203_vm4, %v2764_v50 }
 0x8f1   :  { %2833 = vmatmul.msk.f32.gmra.mxu0 %vm203_vm4, %v2825_v51  ;;  %2773 = vmatmul.msk.f32.gmra.mxu3 %vm203_vm4, %v2765_v52 }
 0x8f9   :  { %2834 = vmatmul.msk.f32.gmra.mxu0 %vm203_vm4, %v2826_v53 }
 0x901   :  { %2835 = vmatmul.msk.f32.gmra.mxu0 %vm203_vm4, %v2827_v54 }
 0x909   :  { %2836 = vmatmul.msk.f32.gmra.mxu0 %vm203_vm4, %v2828_v55 }
 0x911   :  { %2837 = vmatmul.msk.f32.gmra.mxu0 %vm203_vm4, %v2829_v56 }
 0x916   :  { %v1745_v57 = vpop.f32.mrf.mxu0  ;;  %v1810_v61 = vpop.f32.mrf.mxu1 }
 0x917   :  { %v1811_v35 = vadd.f32 %v1810_v61, %v1745_v57 }
 0x91e   :  { %v1748_v58 = vpop.f32.mrf.mxu0  ;;  %v1813_v0 = vpop.f32.mrf.mxu1 }
 0x91f   :  { %v1814_v7 = vadd.f32 %v1813_v0, %v1748_v58 }
 0x926   :  { %v1751_v32 = vpop.f32.mrf.mxu0  ;;  %v1816_v4 = vpop.f32.mrf.mxu1 }
 0x927   :  { %v1817_v14 = vadd.f32 %v1816_v4, %v1751_v32 }
 0x92e   :  { %v1754_v34 = vpop.f32.mrf.mxu0  ;;  %v1819_v12 = vpop.f32.mrf.mxu1 }
 0x92f   :  { %v1820_v23 = vadd.f32 %v1819_v12, %v1754_v34 }
 0x936   :  { %v1757_v59 = vpop.f32.mrf.mxu0 }
 0x937   :  { %v1822_v21 = vpop.f32.mrf.mxu1 }
 0x938   :  { %v1823_v26 = vadd.f32 %v1822_v21, %v1757_v59 }
 0x93c   :  { %v1968_v62 = vpop.f32.mrf.mxu3 }
 0x93d   :  { %v1992_v45 = vadd.f32 %v1968_v62, %v1811_v35 }
 0x93e   :  { %v1760_v60 = vpop.f32.mrf.mxu0 }
 0x93f   :  { %v1825_v27 = vpop.f32.mrf.mxu1 }
 0x940   :  { %v1826_v36 = vadd.f32 %v1825_v27, %v1760_v60 }
 0x944   :  { %v1971_v2 = vpop.f32.mrf.mxu3 }
 0x945   :  { %v1993_v8 = vadd.f32 %v1971_v2, %v1814_v7 }
 0x946   :  { %v1763_v63 = vpop.f32.mrf.mxu0 }
 0x947   :  { %v1828_v39 = vpop.f32.mrf.mxu1 }
 0x948   :  { %v1829_v43 = vadd.f32 %v1828_v39, %v1763_v63 }
 0x94c   :  { %v1974_v6 = vpop.f32.mrf.mxu3 }
 0x94d   :  { %v1994_v15 = vadd.f32 %v1974_v6, %v1817_v14 }
 0x94e   :  { %v1766_v1 = vpop.f32.mrf.mxu0 }
 0x94f   :  { %v1831_v49 = vpop.f32.mrf.mxu1 }
 0x950   :  { %v1832_v51 = vadd.f32 %v1831_v49, %v1766_v1 }
 0x954   :  { %v1977_v13 = vpop.f32.mrf.mxu3 }
 0x955   :  { %v1995_v22 = vadd.f32 %v1977_v13, %v1820_v23 }
 0x956   :  { %v2134_v3 = vpop.f32.mrf.mxu0 }
 0x957   :  { %v2158_v5 = vadd.f32 %v2134_v3, %v1992_v45 }
 0x959   :  { %2944 = vtanh.f32 %v2158_v5 }
 0x95c   :  { %v1980_v24 = vpop.f32.mrf.mxu3 }
 0x95d   :  { %v1996_v28 = vadd.f32 %v1980_v24, %v1823_v26 }
 0x95e   :  { %v2137_v9 = vpop.f32.mrf.mxu0 }
 0x95f   :  { %v2945_v10 = vpop.eup %2944  ;;  %v2159_v11 = vadd.f32 %v2137_v9, %v1993_v8 }
 0x960   :  { %2174 = vst.msk [vmem:[%s3876_s17] sm:$0xff] %vm203_vm4, %v2945_v10 }
 0x961   :  { %2946 = vtanh.f32 %v2159_v11 }
 0x964   :  { %v1983_v30 = vpop.f32.mrf.mxu3 }
 0x965   :  { %v1997_v37 = vadd.f32 %v1983_v30, %v1826_v36 }
 0x966   :  { %v2140_v17 = vpop.f32.mrf.mxu0 }
 0x967   :  { %v2947_v19 = vpop.eup %2946  ;;  %v2160_v20 = vadd.f32 %v2140_v17, %v1994_v15 }
 0x968   :  { %2175 = vst.msk [vmem:[%s3876_s17 + $0x8] sm:$0xff] %vm203_vm4, %v2947_v19 }
 0x969   :  { %2948 = vtanh.f32 %v2160_v20 }
 0x96c   :  { %v1986_v42 = vpop.f32.mrf.mxu3 }
 0x96d   :  { %v1998_v44 = vadd.f32 %v1986_v42, %v1829_v43 }
 0x96e   :  { %v2143_v25 = vpop.f32.mrf.mxu0 }
 0x96f   :  { %v2949_v16 = vpop.eup %2948  ;;  %v2161_v18 = vadd.f32 %v2143_v25, %v1995_v22 }
 0x970   :  { %2176 = vst.msk [vmem:[%s3876_s17 + $0x10] sm:$0xff] %vm203_vm4, %v2949_v16 }
 0x971   :  { %2950 = vtanh.f32 %v2161_v18 }
 0x974   :  { %v1989_v50 = vpop.f32.mrf.mxu3 }
 0x975   :  { %v1999_v52 = vadd.f32 %v1989_v50, %v1832_v51 }
 0x976   :  { %v2146_v29 = vpop.f32.mrf.mxu0 }
 0x977   :  { %v2951_v31 = vpop.eup %2950  ;;  %v2162_v33 = vadd.f32 %v2146_v29, %v1996_v28 }
 0x978   :  { %2177 = vst.msk [vmem:[%s3876_s17 + $0x18] sm:$0xff] %vm203_vm4, %v2951_v31 }
 0x979   :  { %2952 = vtanh.f32 %v2162_v33 }
 0x97e   :  { %v2149_v38 = vpop.f32.mrf.mxu0 }
 0x97f   :  { %v2953_v40 = vpop.eup %2952  ;;  %v2163_v41 = vadd.f32 %v2149_v38, %v1997_v37 }
 0x980   :  { %2178 = vst.msk [vmem:[%s3876_s17 + $0x20] sm:$0xff] %vm203_vm4, %v2953_v40 }
 0x981   :  { %2954 = vtanh.f32 %v2163_v41 }
 0x986   :  { %v2152_v46 = vpop.f32.mrf.mxu0 }
 0x987   :  { %v2955_v47 = vpop.eup %2954  ;;  %v2164_v48 = vadd.f32 %v2152_v46, %v1998_v44 }
 0x988   :  { %2179 = vst.msk [vmem:[%s3876_s17 + $0x28] sm:$0xff] %vm203_vm4, %v2955_v47 }
 0x989   :  { %2956 = vtanh.f32 %v2164_v48 }
 0x98e   :  { %v2155_v53 = vpop.f32.mrf.mxu0 }
 0x98f   :  { %v2957_v54 = vpop.eup %2956  ;;  %v2165_v55 = vadd.f32 %v2155_v53, %v1999_v52 }
 0x990   :  { %2180 = vst.msk [vmem:[%s3876_s17 + $0x30] sm:$0xff] %vm203_vm4, %v2957_v54 }
 0x991   :  { %2958 = vtanh.f32 %v2165_v55 }
 0x997   :  { %v2959_v56 = vpop.eup %2958 }
 0x998   :  { %2181 = vst.msk [vmem:[%s3876_s17 + $0x38] sm:$0xff] %vm203_vm4, %v2959_v56 }

</bundles_post_ra>
